<compile_context>
chip_gen: v7x
topology: tpu7x:2x2x1
jax: 0.10.0
libtpu: 0.0.40
codegen_flags: <defaults>
</compile_context>

<pallas_src>
import math
import functools

import jax
import jax.numpy as jnp
from jax.experimental import pallas as pl
from jax.experimental.pallas import tpu as pltpu

LN_EPS = 1e-5                                        # PyTorch nn.LayerNorm default
NEG_MASK = float(jnp.finfo(jnp.float32).min) / 2.0   # finite sentinel: exp underflows to 0
VMEM_CAP = 64 * 1024 * 1024                          # smallest physical VMEM (v7x per-TC)
VMEM_FLOOR = 16 * 1024 * 1024


def _layernorm(y, gamma, beta):
    mu = jnp.mean(y, axis=-1, keepdims=True)
    var = jnp.mean((y - mu) ** 2, axis=-1, keepdims=True)
    return (y - mu) * jax.lax.rsqrt(var + LN_EPS) * gamma + beta


# --- single-buffered BlockSpecs for grid-invariant operands (feature-detected) -----
def _make_invariant_spec_factory():
    try:
        pl.BlockSpec((8, 128), lambda i: (0, 0), pipeline_mode=pl.Buffered(1))

        def factory(shape, index_map):
            return pl.BlockSpec(shape, index_map, pipeline_mode=pl.Buffered(1))
    except Exception:  # older jax without pipeline_mode / Buffered: fall back cleanly
        def factory(shape, index_map):
            return pl.BlockSpec(shape, index_map)
    return factory


_invariant_spec = _make_invariant_spec_factory()


def _vmem_limit(nbytes):
    return int(min(VMEM_CAP, max(VMEM_FLOOR, 2 * int(nbytes))))


# ---------------------------------------------------------------------------
# Kernels
# ---------------------------------------------------------------------------
def _layer_kernel(x_ref, pad_ref, wqkv_ref, bqkv_ref, wo_ref, bo_ref,
                  ln1_g_ref, ln1_b_ref, w1_ref, b1_ref, w2_ref, b2_ref,
                  ln2_g_ref, ln2_b_ref, o_ref, ctx_ref, *,
                  n_heads, d_k, n_seqs, seq_len, mm_dtype):
    """Fused transformer layer for `n_seqs` sequences (rows flattened to (n_seqs*T, D))."""
    hdk = n_heads * d_k
    x = x_ref[...]                                            # (Mb, D) f32, Mb = n_seqs*T

    # ---- fused QKV projection (one MXU pass, N = 3*hdk) ----
    qkv = jnp.dot(x.astype(mm_dtype), wqkv_ref[...],
                  preferred_element_type=jnp.float32) + bqkv_ref[...]
    scale = jnp.float32(1.0 / math.sqrt(d_k))
    q = (qkv[:, :hdk] * scale).astype(mm_dtype)               # 1/sqrt(d_k) folded into q once
    k = qkv[:, hdk:2 * hdk].astype(mm_dtype)
    v = qkv[:, 2 * hdk:3 * hdk].astype(mm_dtype)

    # ---- combined causal + pad keep-mask for all sequences in the block (built once) ----
    row = jax.lax.broadcasted_iota(jnp.int32, (seq_len, seq_len), 0)
    col = jax.lax.broadcasted_iota(jnp.int32, (seq_len, seq_len), 1)
    causal = col <= row                                       # (T, T)
    keep_all = jnp.logical_and(causal[None, :, :], pad_ref[...] != 0.0)   # (Bb, T, T)

    # ---- causal multi-head attention: per-head outputs go straight into ctx scratch ----
    # TODO(synk): at real sizes use flash-style key-block tiling with d_k a multiple
    #             of 128 so score matmuls are not tiny 8x8 MXU pushes (toy-size moot).
    for b in range(n_seqs):                                   # static; Bb kept small by grid cap
        lo = b * seq_len
        qb, kb, vb = q[lo:lo + seq_len], k[lo:lo + seq_len], v[lo:lo + seq_len]
        keep = keep_all[b]
        for h in range(n_heads):
            c0 = h * d_k
            s = jnp.dot(qb[:, c0:c0 + d_k], kb[:, c0:c0 + d_k].T,
                        preferred_element_type=jnp.float32)   # (T, T)
            s = jnp.where(keep, s, NEG_MASK)                  # finite sentinel (no NaN)
            s = s - jnp.max(s, axis=-1, keepdims=True)
            p = jnp.exp(s)
            p = p * pl.reciprocal(jnp.sum(p, axis=-1, keepdims=True), approx=True)
            ctx_ref[lo:lo + seq_len, c0:c0 + d_k] = jnp.dot(
                p.astype(mm_dtype), vb[:, c0:c0 + d_k],
                preferred_element_type=jnp.float32)

    # ---- single full-K output projection + residual + LN1 ----
    attn = jnp.dot(ctx_ref[...].astype(mm_dtype), wo_ref[...],
                   preferred_element_type=jnp.float32) + bo_ref[...]
    y1 = _layernorm(x + attn, ln1_g_ref[...], ln1_b_ref[...])

    # ---- FFN (Linear -> GELU -> Linear) + residual + LN2 ----
    ff = jnp.dot(y1.astype(mm_dtype), w1_ref[...],
                 preferred_element_type=jnp.float32) + b1_ref[...]
    ff = jax.nn.gelu(ff, approximate=True)
    y2 = y1 + jnp.dot(ff.astype(mm_dtype), w2_ref[...],
                      preferred_element_type=jnp.float32) + b2_ref[...]
    o_ref[...] = _layernorm(y2, ln2_g_ref[...], ln2_b_ref[...])


def _final_kernel(x_ref, g_ref, b_ref, w_ref, fb_ref, o_ref, xn_ref):
    """Final LayerNorm (computed once per row block, cached) + one vocab tile of fc."""
    @pl.when(pl.program_id(1) == 0)
    def _():
        xn_ref[...] = _layernorm(x_ref[...], g_ref[...], b_ref[...]).astype(xn_ref.dtype)
    o_ref[...] = jnp.dot(xn_ref[...], w_ref[...],
                         preferred_element_type=jnp.float32) + fb_ref[...]


# ---------------------------------------------------------------------------
# pallas_call wrappers
# ---------------------------------------------------------------------------
def _pick_batch_block(B, T, target_rows=256, min_grid_steps=2):
    """Largest Bb dividing B with Bb*T <= target_rows, (Bb*T) % 8 == 0, and at least
    `min_grid_steps` grid steps when B allows (v7x 2-TC sharding + pipelining)."""
    cap = B if B < min_grid_steps else B // min_grid_steps
    start = max(1, min(cap, target_rows // max(T, 1)))
    for bb in range(start, 0, -1):
        if B % bb == 0 and (bb * T) % 8 == 0:
            return bb
    return B   # fall back: single block equal to the full array (always legal)


def _pick_vocab_tile(V, target=2048):
    if V <= target:
        return V
    for t in range(target, 0, -1):
        if V % t == 0 and t % 128 == 0:
            return t
    return V


def transformer_layer(h, pad3, wqkv, bqkv, wo, bo, g1, be1, w1, b1, w2, b2, g2, be2,
                      *, n_heads, d_k, batch_block, seq_len, mm_dtype):
    M, D = h.shape
    B = pad3.shape[0]
    Bb = batch_block
    Mb = Bb * seq_len
    hdk = n_heads * d_k
    d_ff = w1.shape[1]

    kern = functools.partial(_layer_kernel, n_heads=n_heads, d_k=d_k,
                             n_seqs=Bb, seq_len=seq_len, mm_dtype=mm_dtype)

    # Grid-invariant operands (weights / biases / LN params): single-buffered.
    weights = [wqkv, bqkv, wo, bo, g1, be1, w1, b1, w2, b2, g2, be2]
    weight_specs = [_invariant_spec(w.shape, lambda i: (0, 0)) for w in weights]

    # VMEM budget: double-buffered activation blocks + single-buffered weights +
    # ctx scratch + in-kernel temporaries (qkv / ffn hidden / scores), 2x headroom.
    act_bytes = 2 * (Mb * D * 4) + Bb * seq_len * 4
    w_bytes = sum(int(w.size) * w.dtype.itemsize for w in weights)
    tmp_bytes = Mb * (3 * hdk + d_ff + hdk) * 4 + seq_len * seq_len * 4
    limit = _vmem_limit(2 * act_bytes + w_bytes + Mb * hdk * 4 + tmp_bytes)

    return pl.pallas_call(
        kern,
        out_shape=jax.ShapeDtypeStruct((M, D), jnp.float32),
        grid=(B // Bb,),
        in_specs=[
            pl.BlockSpec((Mb, D), lambda i: (i, 0)),              # residual stream block
            pl.BlockSpec((Bb, 1, seq_len), lambda i: (i, 0, 0)),  # pad mask
            *weight_specs,
        ],
        out_specs=pl.BlockSpec((Mb, D), lambda i: (i, 0)),
        scratch_shapes=[pltpu.VMEM((Mb, hdk), jnp.float32)],      # per-head ctx buffer
        compiler_params=pltpu.CompilerParams(
            dimension_semantics=("parallel",), vmem_limit_bytes=limit),
    )(h, pad3, *weights)


def final_proj(h, ln_g, ln_b, fc_w, fc_b, *, batch_block, seq_len, mm_dtype):
    M, D = h.shape
    V = fc_w.shape[1]
    Mb = batch_block * seq_len
    tile_v = _pick_vocab_tile(V)

    w_bytes = D * tile_v * jnp.dtype(fc_w.dtype).itemsize + tile_v * 4
    act_bytes = Mb * D * 4 + Mb * tile_v * 4 + 2 * D * 4
    limit = _vmem_limit(2 * (act_bytes + w_bytes) + Mb * D * 4)

    return pl.pallas_call(
        _final_kernel,
        out_shape=jax.ShapeDtypeStruct((M, V), jnp.float32),
        grid=(M // Mb, V // tile_v),
        in_specs=[
            pl.BlockSpec((Mb, D), lambda i, j: (i, 0)),           # row block (re-used over j)
            _invariant_spec((1, D), lambda i, j: (0, 0)),         # ln gamma
            _invariant_spec((1, D), lambda i, j: (0, 0)),         # ln beta
            pl.BlockSpec((D, tile_v), lambda i, j: (0, j)),       # vocab-tiled fc_w
            pl.BlockSpec((1, tile_v), lambda i, j: (0, j)),       # vocab-tiled fc_b
        ],
        out_specs=pl.BlockSpec((Mb, tile_v), lambda i, j: (i, j)),
        scratch_shapes=[pltpu.VMEM((Mb, D), mm_dtype)],           # cached LN(x) across vocab tiles
        compiler_params=pltpu.CompilerParams(
            dimension_semantics=("parallel", "arbitrary"), vmem_limit_bytes=limit),
    )(h, ln_g, ln_b, fc_w, fc_b)


# ---------------------------------------------------------------------------
# Parameters / glue
# ---------------------------------------------------------------------------
def positional_encoding(max_len, d_model):
    pos = jnp.arange(max_len, dtype=jnp.float32)[:, None]
    div = jnp.exp(jnp.arange(0, d_model, 2, dtype=jnp.float32)
                  * (-math.log(10000.0) / d_model))
    pe = jnp.zeros((max_len, d_model), jnp.float32)
    pe = pe.at[:, 0::2].set(jnp.sin(pos * div))
    pe = pe.at[:, 1::2].set(jnp.cos(pos * div))
    return pe


def init_params(key, vocab_size, max_len, d_k, d_model, n_heads, n_layers):
    hdk = n_heads * d_k
    d_ff = 4 * d_model
    keys = jax.random.split(key, n_layers + 2)

    def dense(k, fan_in, fan_out):
        # PyTorch nn.Linear default init: U(-1/sqrt(fan_in), 1/sqrt(fan_in))
        lim = 1.0 / math.sqrt(fan_in)
        kw, kb = jax.random.split(k)
        w = jax.random.uniform(kw, (fan_in, fan_out), jnp.float32, -lim, lim)
        b = jax.random.uniform(kb, (1, fan_out), jnp.float32, -lim, lim)
        return w, b

    params = {
        "emb": jax.random.normal(keys[0], (vocab_size, d_model), jnp.float32),  # nn.Embedding ~ N(0,1)
        "pe": positional_encoding(max_len, d_model),
        "ln_g": jnp.ones((1, d_model), jnp.float32),
        "ln_b": jnp.zeros((1, d_model), jnp.float32),
    }
    params["fc_w"], params["fc_b"] = dense(keys[1], d_model, vocab_size)

    blocks = []
    for layer in range(n_layers):
        ks = jax.random.split(keys[2 + layer], 6)
        blk = {}
        blk["wq"], blk["bq"] = dense(ks[0], d_model, hdk)
        blk["wk"], blk["bk"] = dense(ks[1], d_model, hdk)
        blk["wv"], blk["bv"] = dense(ks[2], d_model, hdk)
        blk["wo"], blk["bo"] = dense(ks[3], hdk, d_model)
        blk["w1"], blk["b1"] = dense(ks[4], d_model, d_ff)
        blk["w2"], blk["b2"] = dense(ks[5], d_ff, d_model)
        blk["ln1_g"] = jnp.ones((1, d_model), jnp.float32)
        blk["ln1_b"] = jnp.zeros((1, d_model), jnp.float32)
        blk["ln2_g"] = jnp.ones((1, d_model), jnp.float32)
        blk["ln2_b"] = jnp.zeros((1, d_model), jnp.float32)
        blocks.append(blk)
    params["blocks"] = blocks
    return params


def prepare_params(params, mm_dtype):
    """Hoisted out of the forward: fuse Q/K/V weights and pre-cast matmul weights once."""
    prep = {
        "emb": params["emb"],
        "pe": params["pe"],
        "ln_g": params["ln_g"],
        "ln_b": params["ln_b"],
        "fc_w": params["fc_w"].astype(mm_dtype),
        "fc_b": params["fc_b"],
    }
    blocks = []
    for blk in params["blocks"]:
        blocks.append({
            "wqkv": jnp.concatenate([blk["wq"], blk["wk"], blk["wv"]], axis=1).astype(mm_dtype),
            "bqkv": jnp.concatenate([blk["bq"], blk["bk"], blk["bv"]], axis=1),
            "wo": blk["wo"].astype(mm_dtype), "bo": blk["bo"],
            "ln1_g": blk["ln1_g"], "ln1_b": blk["ln1_b"],
            "w1": blk["w1"].astype(mm_dtype), "b1": blk["b1"],
            "w2": blk["w2"].astype(mm_dtype), "b2": blk["b2"],
            "ln2_g": blk["ln2_g"], "ln2_b": blk["ln2_b"],
        })
    prep["blocks"] = blocks
    return prep


def decoder_forward(prep, x_tokens, pad_mask, *, n_heads, d_k, mm_dtype=jnp.float32):
    B, T = x_tokens.shape
    D = prep["emb"].shape[1]
    h = jnp.take(prep["emb"], x_tokens, axis=0)            # embedding gather (glue)
    h = h + prep["pe"][None, :T, :]                        # positional encoding (glue)
    pad3 = pad_mask.astype(jnp.float32).reshape(B, 1, T)
    Bb = _pick_batch_block(B, T)
    h = h.reshape(B * T, D)                                # residual stream kept flat (M, D)
    for blk in prep["blocks"]:
        h = transformer_layer(
            h, pad3, blk["wqkv"], blk["bqkv"], blk["wo"], blk["bo"],
            blk["ln1_g"], blk["ln1_b"], blk["w1"], blk["b1"],
            blk["w2"], blk["b2"], blk["ln2_g"], blk["ln2_b"],
            n_heads=n_heads, d_k=d_k, batch_block=Bb, seq_len=T, mm_dtype=mm_dtype)
    logits = final_proj(h, prep["ln_g"], prep["ln_b"], prep["fc_w"], prep["fc_b"],
                        batch_block=Bb, seq_len=T, mm_dtype=mm_dtype)
    return logits.reshape(B, T, -1)


# ---------------------------------------------------------------------------
# Pure-JAX reference (for a sanity check)
# ---------------------------------------------------------------------------
def decoder_ref(params, x_tokens, pad_mask, *, n_heads, d_k):
    B, T = x_tokens.shape
    dot = functools.partial(jnp.matmul, precision=jax.lax.Precision.HIGHEST)
    h = params["emb"][x_tokens] + params["pe"][None, :T, :]
    causal = jnp.tril(jnp.ones((T, T), bool))
    keep = causal[None, :, :] & (pad_mask[:, None, :] != 0)
    for blk in params["blocks"]:
        q = dot(h, blk["wq"]) + blk["bq"]
        k = dot(h, blk["wk"]) + blk["bk"]
        v = dot(h, blk["wv"]) + blk["bv"]
        split = lambda a: a.reshape(B, T, n_heads, d_k).transpose(0, 2, 1, 3)
        qh, kh, vh = split(q), split(k), split(v)
        s = jnp.einsum("bhqd,bhkd->bhqk", qh, kh,
                       precision=jax.lax.Precision.HIGHEST) / math.sqrt(d_k)
        s = jnp.where(keep[:, None, :, :], s, -jnp.inf)
        p = jax.nn.softmax(s, axis=-1)
        a = jnp.einsum("bhqk,bhkd->bhqd", p, vh, precision=jax.lax.Precision.HIGHEST)
        a = a.transpose(0, 2, 1, 3).reshape(B, T, n_heads * d_k)
        h = _layernorm(h + dot(a, blk["wo"]) + blk["bo"], blk["ln1_g"], blk["ln1_b"])
        ff = jax.nn.gelu(dot(h, blk["w1"]) + blk["b1"], approximate=True)
        h = _layernorm(h + dot(ff, blk["w2"]) + blk["b2"], blk["ln2_g"], blk["ln2_b"])
    h = _layernorm(h, params["ln_g"], params["ln_b"])
    return dot(h, params["fc_w"]) + params["fc_b"]


if __name__ == "__main__":
    vocab_size, max_len, d_k, d_model, n_heads, n_layers, dropout_prob = 128, 16, 8, 32, 4, 2, 0.1
    B, T = 2, 8

    key = jax.random.PRNGKey(0)
    kp, kx = jax.random.split(key)
    params = init_params(kp, vocab_size, max_len, d_k, d_model, n_heads, n_layers)
    x_tokens = jax.random.randint(kx, (B, T), 0, vocab_size, dtype=jnp.int32)
    pad_mask = jnp.ones((B, T), jnp.int32).at[1, 6:].set(0)   # last two tokens of row 1 are padding

    ref = decoder_ref(params, x_tokens, pad_mask, n_heads=n_heads, d_k=d_k)

    # f32 matmul operands: tight check against the f32 reference.
    fwd_f32 = jax.jit(functools.partial(decoder_forward, n_heads=n_heads, d_k=d_k,
                                        mm_dtype=jnp.float32))
    logits = jax.block_until_ready(
        fwd_f32(prepare_params(params, jnp.float32), x_tokens, pad_mask))
    assert logits.shape == (B, T, vocab_size), logits.shape
    assert bool(jnp.all(jnp.isfinite(logits)))
    max_err = float(jnp.max(jnp.abs(logits - ref)))
    assert max_err < 1e-2, f"f32 mismatch vs reference: {max_err}"

    # bf16 matmul operands (what you'd use at real model sizes): looser check.
    fwd_bf16 = jax.jit(functools.partial(decoder_forward, n_heads=n_heads, d_k=d_k,
                                         mm_dtype=jnp.bfloat16))
    logits_bf16 = jax.block_until_ready(
        fwd_bf16(prepare_params(params, jnp.bfloat16), x_tokens, pad_mask))
    assert bool(jnp.all(jnp.isfinite(logits_bf16)))
    err_bf16 = float(jnp.max(jnp.abs(logits_bf16 - ref)))
    assert err_bf16 < 3e-1, f"bf16 mismatch vs reference: {err_bf16}"

    print("KERNEL_OK")
</pallas_src>

<mosaic_0001>
module attributes {stable_mosaic.version = 11 : i64} {
  func.func @_final_kernel(%arg0: i32, %arg1: i32, %arg2: memref<8x32xf32, #tpu.memory_space<vmem>>, %arg3: memref<1x32xf32, #tpu.memory_space<vmem>>, %arg4: memref<1x32xf32, #tpu.memory_space<vmem>>, %arg5: memref<32x128xf32, #tpu.memory_space<vmem>>, %arg6: memref<1x128xf32, #tpu.memory_space<vmem>>, %arg7: memref<8x128xf32, #tpu.memory_space<vmem>>, %arg8: memref<8x32xf32, #tpu.memory_space<vmem>>) attributes {dimension_semantics = [#tpu.dimension_semantics<parallel>, #tpu.dimension_semantics<arbitrary>], iteration_bounds = array<i64: 2, 1>, scalar_prefetch = 0 : i64, scratch_operands = 1 : i64, tpu.core_type = #tpu.core_type<tc>, window_params = [{transform_indices = @transform_0, window_bounds = array<i64: 8, 32>}, {pipeline_mode = #tpu.pipeline_mode<synchronous>, transform_indices = @transform_1, window_bounds = array<i64: 1, 32>}, {pipeline_mode = #tpu.pipeline_mode<synchronous>, transform_indices = @transform_2, window_bounds = array<i64: 1, 32>}, {transform_indices = @transform_3, window_bounds = array<i64: 32, 128>}, {transform_indices = @transform_4, window_bounds = array<i64: 1, 128>}, {transform_indices = @transform_5, window_bounds = array<i64: 8, 128>}]} {
    %c0_i32 = arith.constant 0 : i32
    %0 = arith.cmpi eq, %arg1, %c0_i32 : i32
    %1 = arith.extui %0 : i1 to i32
    %c0_i32_0 = arith.constant 0 : i32
    %2 = arith.cmpi ne, %1, %c0_i32_0 : i32
    scf.if %2 {
      %c0_8 = arith.constant 0 : index
      %c0_9 = arith.constant 0 : index
      %10 = vector.load %arg2[%c0_8, %c0_9] : memref<8x32xf32, #tpu.memory_space<vmem>>, vector<8x32xf32>
      %c0_10 = arith.constant 0 : index
      %c0_11 = arith.constant 0 : index
      %11 = vector.load %arg3[%c0_10, %c0_11] : memref<1x32xf32, #tpu.memory_space<vmem>>, vector<1x32xf32>
      %c0_12 = arith.constant 0 : index
      %c0_13 = arith.constant 0 : index
      %12 = vector.load %arg4[%c0_12, %c0_13] : memref<1x32xf32, #tpu.memory_space<vmem>>, vector<1x32xf32>
      %cst_14 = arith.constant dense<0.000000e+00> : vector<8xf32>
      %13 = vector.multi_reduction <add>, %10, %cst_14 [1] : vector<8x32xf32> to vector<8xf32>
      %14 = vector.shape_cast %13 : vector<8xf32> to vector<8x1xf32>
      %cst_15 = arith.constant 3.200000e+01 : f32
      %15 = vector.broadcast %cst_15 : f32 to vector<8x1xf32>
      %16 = arith.divf %14, %15 : vector<8x1xf32>
      %17 = vector.broadcast %16 : vector<8x1xf32> to vector<8x32xf32>
      %18 = arith.subf %10, %17 : vector<8x32xf32>
      %19 = arith.mulf %18, %18 : vector<8x32xf32>
      %cst_16 = arith.constant dense<0.000000e+00> : vector<8xf32>
      %20 = vector.multi_reduction <add>, %19, %cst_16 [1] : vector<8x32xf32> to vector<8xf32>
      %21 = vector.shape_cast %20 : vector<8xf32> to vector<8x1xf32>
      %cst_17 = arith.constant 3.200000e+01 : f32
      %22 = vector.broadcast %cst_17 : f32 to vector<8x1xf32>
      %23 = arith.divf %21, %22 : vector<8x1xf32>
      %24 = vector.broadcast %16 : vector<8x1xf32> to vector<8x32xf32>
      %25 = arith.subf %10, %24 : vector<8x32xf32>
      %cst_18 = arith.constant 9.99999974E-6 : f32
      %26 = vector.broadcast %cst_18 : f32 to vector<8x1xf32>
      %27 = arith.addf %23, %26 : vector<8x1xf32>
      %28 = math.rsqrt %27 : vector<8x1xf32>
      %29 = vector.broadcast %28 : vector<8x1xf32> to vector<8x32xf32>
      %30 = arith.mulf %25, %29 : vector<8x32xf32>
      %31 = vector.broadcast %11 : vector<1x32xf32> to vector<8x32xf32>
      %32 = arith.mulf %30, %31 : vector<8x32xf32>
      %33 = vector.broadcast %12 : vector<1x32xf32> to vector<8x32xf32>
      %34 = arith.addf %32, %33 : vector<8x32xf32>
      %c0_19 = arith.constant 0 : index
      %c0_20 = arith.constant 0 : index
      %35 = vector.load %arg8[%c0_19, %c0_20] : memref<8x32xf32, #tpu.memory_space<vmem>>, vector<8x32xf32>
      tpu.vector_store %arg8[%c0_19, %c0_20], %34 {strides = array<i32>} : memref<8x32xf32, #tpu.memory_space<vmem>>, vector<8x32xf32>,
    } else {
    }
    %c0 = arith.constant 0 : index
    %c0_1 = arith.constant 0 : index
    %3 = vector.load %arg8[%c0, %c0_1] : memref<8x32xf32, #tpu.memory_space<vmem>>, vector<8x32xf32>
    %c0_2 = arith.constant 0 : index
    %c0_3 = arith.constant 0 : index
    %4 = vector.load %arg5[%c0_2, %c0_3] : memref<32x128xf32, #tpu.memory_space<vmem>>, vector<32x128xf32>
    %cst = arith.constant dense<0.000000e+00> : vector<8x128xf32>
    %5 = tpu.matmul %3, %4, %cst {dimension_numbers = #tpu.dot_dimension_numbers<[1], [0], [0], [1], [0, 0, 1, 1], [], []>} : vector<8x32xf32>, vector<32x128xf32>, vector<8x128xf32> -> vector<8x128xf32>
    %c0_4 = arith.constant 0 : index
    %c0_5 = arith.constant 0 : index
    %6 = vector.load %arg6[%c0_4, %c0_5] : memref<1x128xf32, #tpu.memory_space<vmem>>, vector<1x128xf32>
    %7 = vector.broadcast %6 : vector<1x128xf32> to vector<8x128xf32>
    %8 = arith.addf %5, %7 : vector<8x128xf32>
    %c0_6 = arith.constant 0 : index
    %c0_7 = arith.constant 0 : index
    %9 = vector.load %arg7[%c0_6, %c0_7] : memref<8x128xf32, #tpu.memory_space<vmem>>, vector<8x128xf32>
    tpu.vector_store %arg7[%c0_6, %c0_7], %8 {strides = array<i32>} : memref<8x128xf32, #tpu.memory_space<vmem>>, vector<8x128xf32>,
    return
  }
  func.func @transform_0(%arg0: i32, %arg1: i32) -> (i32, i32) {
    %c0_i32 = arith.constant 0 : i32
    %c0_i32_0 = arith.constant 0 : i32
    return %arg0, %c0_i32 : i32, i32
  }
  func.func @transform_1(%arg0: i32, %arg1: i32) -> (i32, i32) {
    %c0_i32 = arith.constant 0 : i32
    %c0_i32_0 = arith.constant 0 : i32
    %c0_i32_1 = arith.constant 0 : i32
    return %c0_i32, %c0_i32_0 : i32, i32
  }
  func.func @transform_2(%arg0: i32, %arg1: i32) -> (i32, i32) {
    %c0_i32 = arith.constant 0 : i32
    %c0_i32_0 = arith.constant 0 : i32
    %c0_i32_1 = arith.constant 0 : i32
    return %c0_i32, %c0_i32_0 : i32, i32
  }
  func.func @transform_3(%arg0: i32, %arg1: i32) -> (i32, i32) {
    %c0_i32 = arith.constant 0 : i32
    %c0_i32_0 = arith.constant 0 : i32
    return %c0_i32, %arg1 : i32, i32
  }
  func.func @transform_4(%arg0: i32, %arg1: i32) -> (i32, i32) {
    %c0_i32 = arith.constant 0 : i32
    %c0_i32_0 = arith.constant 0 : i32
    return %c0_i32, %arg1 : i32, i32
  }
  func.func @transform_5(%arg0: i32, %arg1: i32) -> (i32, i32) {
    %c0_i32 = arith.constant 0 : i32
    return %arg0, %arg1 : i32, i32
  }
}

module attributes {stable_mosaic.version = 11 : i64} {
  func.func @_layer_kernel(%arg0: i32, %arg1: memref<8x32xf32, #tpu.memory_space<vmem>>, %arg2: memref<1x1x8xf32, #tpu.memory_space<vmem>>, %arg3: memref<32x96xf32, #tpu.memory_space<vmem>>, %arg4: memref<1x96xf32, #tpu.memory_space<vmem>>, %arg5: memref<32x32xf32, #tpu.memory_space<vmem>>, %arg6: memref<1x32xf32, #tpu.memory_space<vmem>>, %arg7: memref<1x32xf32, #tpu.memory_space<vmem>>, %arg8: memref<1x32xf32, #tpu.memory_space<vmem>>, %arg9: memref<32x128xf32, #tpu.memory_space<vmem>>, %arg10: memref<1x128xf32, #tpu.memory_space<vmem>>, %arg11: memref<128x32xf32, #tpu.memory_space<vmem>>, %arg12: memref<1x32xf32, #tpu.memory_space<vmem>>, %arg13: memref<1x32xf32, #tpu.memory_space<vmem>>, %arg14: memref<1x32xf32, #tpu.memory_space<vmem>>, %arg15: memref<8x32xf32, #tpu.memory_space<vmem>>, %arg16: memref<8x32xf32, #tpu.memory_space<vmem>>) attributes {dimension_semantics = [#tpu.dimension_semantics<parallel>], iteration_bounds = array<i64: 2>, scalar_prefetch = 0 : i64, scratch_operands = 1 : i64, tpu.core_type = #tpu.core_type<tc>, window_params = [{transform_indices = @transform_0, window_bounds = array<i64: 8, 32>}, {transform_indices = @transform_1, window_bounds = array<i64: 1, 1, 8>}, {pipeline_mode = #tpu.pipeline_mode<synchronous>, transform_indices = @transform_2, window_bounds = array<i64: 32, 96>}, {pipeline_mode = #tpu.pipeline_mode<synchronous>, transform_indices = @transform_3, window_bounds = array<i64: 1, 96>}, {pipeline_mode = #tpu.pipeline_mode<synchronous>, transform_indices = @transform_4, window_bounds = array<i64: 32, 32>}, {pipeline_mode = #tpu.pipeline_mode<synchronous>, transform_indices = @transform_5, window_bounds = array<i64: 1, 32>}, {pipeline_mode = #tpu.pipeline_mode<synchronous>, transform_indices = @transform_6, window_bounds = array<i64: 1, 32>}, {pipeline_mode = #tpu.pipeline_mode<synchronous>, transform_indices = @transform_7, window_bounds = array<i64: 1, 32>}, {pipeline_mode = #tpu.pipeline_mode<synchronous>, transform_indices = @transform_8, window_bounds = array<i64: 32, 128>}, {pipeline_mode = #tpu.pipeline_mode<synchronous>, transform_indices = @transform_9, window_bounds = array<i64: 1, 128>}, {pipeline_mode = #tpu.pipeline_mode<synchronous>, transform_indices = @transform_10, window_bounds = array<i64: 128, 32>}, {pipeline_mode = #tpu.pipeline_mode<synchronous>, transform_indices = @transform_11, window_bounds = array<i64: 1, 32>}, {pipeline_mode = #tpu.pipeline_mode<synchronous>, transform_indices = @transform_12, window_bounds = array<i64: 1, 32>}, {pipeline_mode = #tpu.pipeline_mode<synchronous>, transform_indices = @transform_13, window_bounds = array<i64: 1, 32>}, {transform_indices = @transform_14, window_bounds = array<i64: 8, 32>}]} {
    %c0 = arith.constant 0 : index
    %c0_0 = arith.constant 0 : index
    %0 = vector.load %arg1[%c0, %c0_0] : memref<8x32xf32, #tpu.memory_space<vmem>>, vector<8x32xf32>
    %c0_1 = arith.constant 0 : index
    %c0_2 = arith.constant 0 : index
    %1 = vector.load %arg3[%c0_1, %c0_2] : memref<32x96xf32, #tpu.memory_space<vmem>>, vector<32x96xf32>
    %cst = arith.constant dense<0.000000e+00> : vector<8x96xf32>
    %2 = tpu.matmul %0, %1, %cst {dimension_numbers = #tpu.dot_dimension_numbers<[1], [0], [0], [1], [0, 0, 1, 1], [], []>} : vector<8x32xf32>, vector<32x96xf32>, vector<8x96xf32> -> vector<8x96xf32>
    %c0_3 = arith.constant 0 : index
    %c0_4 = arith.constant 0 : index
    %3 = vector.load %arg4[%c0_3, %c0_4] : memref<1x96xf32, #tpu.memory_space<vmem>>, vector<1x96xf32>
    %4 = vector.broadcast %3 : vector<1x96xf32> to vector<8x96xf32>
    %5 = arith.addf %2, %4 : vector<8x96xf32>
    %6 = vector.extract_strided_slice %5 {offsets = [0, 0], sizes = [8, 32], strides = [1, 1]} : vector<8x96xf32> to vector<8x32xf32>
    %cst_5 = arith.constant 0.353553385 : f32
    %7 = vector.broadcast %cst_5 : f32 to vector<8x32xf32>
    %8 = arith.mulf %6, %7 : vector<8x32xf32>
    %9 = vector.extract_strided_slice %5 {offsets = [0, 32], sizes = [8, 32], strides = [1, 1]} : vector<8x96xf32> to vector<8x32xf32>
    %10 = vector.extract_strided_slice %5 {offsets = [0, 64], sizes = [8, 32], strides = [1, 1]} : vector<8x96xf32> to vector<8x32xf32>
    %11 = tpu.iota {dimensions = array<i32: 0>} : vector<8x8xi32>
    %12 = tpu.iota {dimensions = array<i32: 1>} : vector<8x8xi32>
    %13 = arith.cmpi sle, %12, %11 : vector<8x8xi32>
    %14 = vector.shape_cast %13 : vector<8x8xi1> to vector<1x8x8xi1>
    %c0_6 = arith.constant 0 : index
    %c0_7 = arith.constant 0 : index
    %c0_8 = arith.constant 0 : index
    %15 = vector.load %arg2[%c0_6, %c0_7, %c0_8] : memref<1x1x8xf32, #tpu.memory_space<vmem>>, vector<1x1x8xf32>
    %cst_9 = arith.constant 0.000000e+00 : f32
    %16 = vector.broadcast %cst_9 : f32 to vector<1x1x8xf32>
    %17 = arith.cmpf one, %15, %16 : vector<1x1x8xf32>
    %18 = vector.broadcast %17 : vector<1x1x8xi1> to vector<1x8x8xi1>
    %19 = arith.andi %14, %18 : vector<1x8x8xi1>
    %20 = vector.shape_cast %19 : vector<1x8x8xi1> to vector<8x8xi1>
    %21 = vector.extract_strided_slice %8 {offsets = [0, 0], sizes = [8, 8], strides = [1, 1]} : vector<8x32xf32> to vector<8x8xf32>
    %22 = vector.extract_strided_slice %9 {offsets = [0, 0], sizes = [8, 8], strides = [1, 1]} : vector<8x32xf32> to vector<8x8xf32>
    %23 = tpu.transpose %22, [1, 0] : vector<8x8xf32> -> vector<8x8xf32>
    %cst_10 = arith.constant dense<0.000000e+00> : vector<8x8xf32>
    %24 = tpu.matmul %21, %23, %cst_10 {dimension_numbers = #tpu.dot_dimension_numbers<[1], [0], [0], [1], [0, 0, 1, 1], [], []>} : vector<8x8xf32>, vector<8x8xf32>, vector<8x8xf32> -> vector<8x8xf32>
    %cst_11 = arith.constant -1.70141173E+38 : f32
    %25 = vector.broadcast %cst_11 : f32 to vector<8x8xf32>
    %26 = arith.select %20, %24, %25 : vector<8x8xi1>, vector<8x8xf32>
    %cst_12 = arith.constant dense<0xFF800000> : vector<8xf32>
    %27 = vector.multi_reduction <maximumf>, %26, %cst_12 [1] : vector<8x8xf32> to vector<8xf32>
    %28 = vector.shape_cast %27 : vector<8xf32> to vector<8x1xf32>
    %29 = vector.broadcast %28 : vector<8x1xf32> to vector<8x8xf32>
    %30 = arith.subf %26, %29 : vector<8x8xf32>
    %31 = math.exp %30 : vector<8x8xf32>
    %cst_13 = arith.constant dense<0.000000e+00> : vector<8xf32>
    %32 = vector.multi_reduction <add>, %31, %cst_13 [1] : vector<8x8xf32> to vector<8xf32>
    %33 = vector.shape_cast %32 : vector<8xf32> to vector<8x1xf32>
    %34 = tpu.reciprocal %33 {approx = true} : vector<8x1xf32> -> vector<8x1xf32>
    %35 = vector.broadcast %34 : vector<8x1xf32> to vector<8x8xf32>
    %36 = arith.mulf %31, %35 : vector<8x8xf32>
    %37 = vector.extract_strided_slice %10 {offsets = [0, 0], sizes = [8, 8], strides = [1, 1]} : vector<8x32xf32> to vector<8x8xf32>
    %cst_14 = arith.constant dense<0.000000e+00> : vector<8x8xf32>
    %38 = tpu.matmul %36, %37, %cst_14 {dimension_numbers = #tpu.dot_dimension_numbers<[1], [0], [0], [1], [0, 0, 1, 1], [], []>} : vector<8x8xf32>, vector<8x8xf32>, vector<8x8xf32> -> vector<8x8xf32>
    %c0_15 = arith.constant 0 : index
    %c0_16 = arith.constant 0 : index
    %39 = vector.load %arg16[%c0_15, %c0_16] : memref<8x32xf32, #tpu.memory_space<vmem>>, vector<8x8xf32>
    tpu.vector_store %arg16[%c0_15, %c0_16], %38 {strides = array<i32>} : memref<8x32xf32, #tpu.memory_space<vmem>>, vector<8x8xf32>,
    %40 = vector.extract_strided_slice %8 {offsets = [0, 8], sizes = [8, 8], strides = [1, 1]} : vector<8x32xf32> to vector<8x8xf32>
    %41 = vector.extract_strided_slice %9 {offsets = [0, 8], sizes = [8, 8], strides = [1, 1]} : vector<8x32xf32> to vector<8x8xf32>
    %42 = tpu.transpose %41, [1, 0] : vector<8x8xf32> -> vector<8x8xf32>
    %cst_17 = arith.constant dense<0.000000e+00> : vector<8x8xf32>
    %43 = tpu.matmul %40, %42, %cst_17 {dimension_numbers = #tpu.dot_dimension_numbers<[1], [0], [0], [1], [0, 0, 1, 1], [], []>} : vector<8x8xf32>, vector<8x8xf32>, vector<8x8xf32> -> vector<8x8xf32>
    %cst_18 = arith.constant -1.70141173E+38 : f32
    %44 = vector.broadcast %cst_18 : f32 to vector<8x8xf32>
    %45 = arith.select %20, %43, %44 : vector<8x8xi1>, vector<8x8xf32>
    %cst_19 = arith.constant dense<0xFF800000> : vector<8xf32>
    %46 = vector.multi_reduction <maximumf>, %45, %cst_19 [1] : vector<8x8xf32> to vector<8xf32>
    %47 = vector.shape_cast %46 : vector<8xf32> to vector<8x1xf32>
    %48 = vector.broadcast %47 : vector<8x1xf32> to vector<8x8xf32>
    %49 = arith.subf %45, %48 : vector<8x8xf32>
    %50 = math.exp %49 : vector<8x8xf32>
    %cst_20 = arith.constant dense<0.000000e+00> : vector<8xf32>
    %51 = vector.multi_reduction <add>, %50, %cst_20 [1] : vector<8x8xf32> to vector<8xf32>
    %52 = vector.shape_cast %51 : vector<8xf32> to vector<8x1xf32>
    %53 = tpu.reciprocal %52 {approx = true} : vector<8x1xf32> -> vector<8x1xf32>
    %54 = vector.broadcast %53 : vector<8x1xf32> to vector<8x8xf32>
    %55 = arith.mulf %50, %54 : vector<8x8xf32>
    %56 = vector.extract_strided_slice %10 {offsets = [0, 8], sizes = [8, 8], strides = [1, 1]} : vector<8x32xf32> to vector<8x8xf32>
    %cst_21 = arith.constant dense<0.000000e+00> : vector<8x8xf32>
    %57 = tpu.matmul %55, %56, %cst_21 {dimension_numbers = #tpu.dot_dimension_numbers<[1], [0], [0], [1], [0, 0, 1, 1], [], []>} : vector<8x8xf32>, vector<8x8xf32>, vector<8x8xf32> -> vector<8x8xf32>
    %c0_22 = arith.constant 0 : index
    %c8 = arith.constant 8 : index
    %58 = vector.load %arg16[%c0_22, %c8] : memref<8x32xf32, #tpu.memory_space<vmem>>, vector<8x8xf32>
    tpu.vector_store %arg16[%c0_22, %c8], %57 {strides = array<i32>} : memref<8x32xf32, #tpu.memory_space<vmem>>, vector<8x8xf32>,
    %59 = vector.extract_strided_slice %8 {offsets = [0, 16], sizes = [8, 8], strides = [1, 1]} : vector<8x32xf32> to vector<8x8xf32>
    %60 = vector.extract_strided_slice %9 {offsets = [0, 16], sizes = [8, 8], strides = [1, 1]} : vector<8x32xf32> to vector<8x8xf32>
    %61 = tpu.transpose %60, [1, 0] : vector<8x8xf32> -> vector<8x8xf32>
    %cst_23 = arith.constant dense<0.000000e+00> : vector<8x8xf32>
    %62 = tpu.matmul %59, %61, %cst_23 {dimension_numbers = #tpu.dot_dimension_numbers<[1], [0], [0], [1], [0, 0, 1, 1], [], []>} : vector<8x8xf32>, vector<8x8xf32>, vector<8x8xf32> -> vector<8x8xf32>
    %cst_24 = arith.constant -1.70141173E+38 : f32
    %63 = vector.broadcast %cst_24 : f32 to vector<8x8xf32>
    %64 = arith.select %20, %62, %63 : vector<8x8xi1>, vector<8x8xf32>
    %cst_25 = arith.constant dense<0xFF800000> : vector<8xf32>
    %65 = vector.multi_reduction <maximumf>, %64, %cst_25 [1] : vector<8x8xf32> to vector<8xf32>
    %66 = vector.shape_cast %65 : vector<8xf32> to vector<8x1xf32>
    %67 = vector.broadcast %66 : vector<8x1xf32> to vector<8x8xf32>
    %68 = arith.subf %64, %67 : vector<8x8xf32>
    %69 = math.exp %68 : vector<8x8xf32>
    %cst_26 = arith.constant dense<0.000000e+00> : vector<8xf32>
    %70 = vector.multi_reduction <add>, %69, %cst_26 [1] : vector<8x8xf32> to vector<8xf32>
    %71 = vector.shape_cast %70 : vector<8xf32> to vector<8x1xf32>
    %72 = tpu.reciprocal %71 {approx = true} : vector<8x1xf32> -> vector<8x1xf32>
    %73 = vector.broadcast %72 : vector<8x1xf32> to vector<8x8xf32>
    %74 = arith.mulf %69, %73 : vector<8x8xf32>
    %75 = vector.extract_strided_slice %10 {offsets = [0, 16], sizes = [8, 8], strides = [1, 1]} : vector<8x32xf32> to vector<8x8xf32>
    %cst_27 = arith.constant dense<0.000000e+00> : vector<8x8xf32>
    %76 = tpu.matmul %74, %75, %cst_27 {dimension_numbers = #tpu.dot_dimension_numbers<[1], [0], [0], [1], [0, 0, 1, 1], [], []>} : vector<8x8xf32>, vector<8x8xf32>, vector<8x8xf32> -> vector<8x8xf32>
    %c0_28 = arith.constant 0 : index
    %c16 = arith.constant 16 : index
    %77 = vector.load %arg16[%c0_28, %c16] : memref<8x32xf32, #tpu.memory_space<vmem>>, vector<8x8xf32>
    tpu.vector_store %arg16[%c0_28, %c16], %76 {strides = array<i32>} : memref<8x32xf32, #tpu.memory_space<vmem>>, vector<8x8xf32>,
    %78 = vector.extract_strided_slice %8 {offsets = [0, 24], sizes = [8, 8], strides = [1, 1]} : vector<8x32xf32> to vector<8x8xf32>
    %79 = vector.extract_strided_slice %9 {offsets = [0, 24], sizes = [8, 8], strides = [1, 1]} : vector<8x32xf32> to vector<8x8xf32>
    %80 = tpu.transpose %79, [1, 0] : vector<8x8xf32> -> vector<8x8xf32>
    %cst_29 = arith.constant dense<0.000000e+00> : vector<8x8xf32>
    %81 = tpu.matmul %78, %80, %cst_29 {dimension_numbers = #tpu.dot_dimension_numbers<[1], [0], [0], [1], [0, 0, 1, 1], [], []>} : vector<8x8xf32>, vector<8x8xf32>, vector<8x8xf32> -> vector<8x8xf32>
    %cst_30 = arith.constant -1.70141173E+38 : f32
    %82 = vector.broadcast %cst_30 : f32 to vector<8x8xf32>
    %83 = arith.select %20, %81, %82 : vector<8x8xi1>, vector<8x8xf32>
    %cst_31 = arith.constant dense<0xFF800000> : vector<8xf32>
    %84 = vector.multi_reduction <maximumf>, %83, %cst_31 [1] : vector<8x8xf32> to vector<8xf32>
    %85 = vector.shape_cast %84 : vector<8xf32> to vector<8x1xf32>
    %86 = vector.broadcast %85 : vector<8x1xf32> to vector<8x8xf32>
    %87 = arith.subf %83, %86 : vector<8x8xf32>
    %88 = math.exp %87 : vector<8x8xf32>
    %cst_32 = arith.constant dense<0.000000e+00> : vector<8xf32>
    %89 = vector.multi_reduction <add>, %88, %cst_32 [1] : vector<8x8xf32> to vector<8xf32>
    %90 = vector.shape_cast %89 : vector<8xf32> to vector<8x1xf32>
    %91 = tpu.reciprocal %90 {approx = true} : vector<8x1xf32> -> vector<8x1xf32>
    %92 = vector.broadcast %91 : vector<8x1xf32> to vector<8x8xf32>
    %93 = arith.mulf %88, %92 : vector<8x8xf32>
    %94 = vector.extract_strided_slice %10 {offsets = [0, 24], sizes = [8, 8], strides = [1, 1]} : vector<8x32xf32> to vector<8x8xf32>
    %cst_33 = arith.constant dense<0.000000e+00> : vector<8x8xf32>
    %95 = tpu.matmul %93, %94, %cst_33 {dimension_numbers = #tpu.dot_dimension_numbers<[1], [0], [0], [1], [0, 0, 1, 1], [], []>} : vector<8x8xf32>, vector<8x8xf32>, vector<8x8xf32> -> vector<8x8xf32>
    %c0_34 = arith.constant 0 : index
    %c24 = arith.constant 24 : index
    %96 = vector.load %arg16[%c0_34, %c24] : memref<8x32xf32, #tpu.memory_space<vmem>>, vector<8x8xf32>
    tpu.vector_store %arg16[%c0_34, %c24], %95 {strides = array<i32>} : memref<8x32xf32, #tpu.memory_space<vmem>>, vector<8x8xf32>,
    %c0_35 = arith.constant 0 : index
    %c0_36 = arith.constant 0 : index
    %97 = vector.load %arg16[%c0_35, %c0_36] : memref<8x32xf32, #tpu.memory_space<vmem>>, vector<8x32xf32>
    %c0_37 = arith.constant 0 : index
    %c0_38 = arith.constant 0 : index
    %98 = vector.load %arg5[%c0_37, %c0_38] : memref<32x32xf32, #tpu.memory_space<vmem>>, vector<32x32xf32>
    %cst_39 = arith.constant dense<0.000000e+00> : vector<8x32xf32>
    %99 = tpu.matmul %97, %98, %cst_39 {dimension_numbers = #tpu.dot_dimension_numbers<[1], [0], [0], [1], [0, 0, 1, 1], [], []>} : vector<8x32xf32>, vector<32x32xf32>, vector<8x32xf32> -> vector<8x32xf32>
    %c0_40 = arith.constant 0 : index
    %c0_41 = arith.constant 0 : index
    %100 = vector.load %arg6[%c0_40, %c0_41] : memref<1x32xf32, #tpu.memory_space<vmem>>, vector<1x32xf32>
    %101 = vector.broadcast %100 : vector<1x32xf32> to vector<8x32xf32>
    %102 = arith.addf %99, %101 : vector<8x32xf32>
    %103 = arith.addf %0, %102 : vector<8x32xf32>
    %c0_42 = arith.constant 0 : index
    %c0_43 = arith.constant 0 : index
    %104 = vector.load %arg7[%c0_42, %c0_43] : memref<1x32xf32, #tpu.memory_space<vmem>>, vector<1x32xf32>
    %c0_44 = arith.constant 0 : index
    %c0_45 = arith.constant 0 : index
    %105 = vector.load %arg8[%c0_44, %c0_45] : memref<1x32xf32, #tpu.memory_space<vmem>>, vector<1x32xf32>
    %cst_46 = arith.constant dense<0.000000e+00> : vector<8xf32>
    %106 = vector.multi_reduction <add>, %103, %cst_46 [1] : vector<8x32xf32> to vector<8xf32>
    %107 = vector.shape_cast %106 : vector<8xf32> to vector<8x1xf32>
    %cst_47 = arith.constant 3.200000e+01 : f32
    %108 = vector.broadcast %cst_47 : f32 to vector<8x1xf32>
    %109 = arith.divf %107, %108 : vector<8x1xf32>
    %110 = vector.broadcast %109 : vector<8x1xf32> to vector<8x32xf32>
    %111 = arith.subf %103, %110 : vector<8x32xf32>
    %112 = arith.mulf %111, %111 : vector<8x32xf32>
    %cst_48 = arith.constant dense<0.000000e+00> : vector<8xf32>
    %113 = vector.multi_reduction <add>, %112, %cst_48 [1] : vector<8x32xf32> to vector<8xf32>
    %114 = vector.shape_cast %113 : vector<8xf32> to vector<8x1xf32>
    %cst_49 = arith.constant 3.200000e+01 : f32
    %115 = vector.broadcast %cst_49 : f32 to vector<8x1xf32>
    %116 = arith.divf %114, %115 : vector<8x1xf32>
    %117 = vector.broadcast %109 : vector<8x1xf32> to vector<8x32xf32>
    %118 = arith.subf %103, %117 : vector<8x32xf32>
    %cst_50 = arith.constant 9.99999974E-6 : f32
    %119 = vector.broadcast %cst_50 : f32 to vector<8x1xf32>
    %120 = arith.addf %116, %119 : vector<8x1xf32>
    %121 = math.rsqrt %120 : vector<8x1xf32>
    %122 = vector.broadcast %121 : vector<8x1xf32> to vector<8x32xf32>
    %123 = arith.mulf %118, %122 : vector<8x32xf32>
    %124 = vector.broadcast %104 : vector<1x32xf32> to vector<8x32xf32>
    %125 = arith.mulf %123, %124 : vector<8x32xf32>
    %126 = vector.broadcast %105 : vector<1x32xf32> to vector<8x32xf32>
    %127 = arith.addf %125, %126 : vector<8x32xf32>
    %c0_51 = arith.constant 0 : index
    %c0_52 = arith.constant 0 : index
    %128 = vector.load %arg9[%c0_51, %c0_52] : memref<32x128xf32, #tpu.memory_space<vmem>>, vector<32x128xf32>
    %cst_53 = arith.constant dense<0.000000e+00> : vector<8x128xf32>
    %129 = tpu.matmul %127, %128, %cst_53 {dimension_numbers = #tpu.dot_dimension_numbers<[1], [0], [0], [1], [0, 0, 1, 1], [], []>} : vector<8x32xf32>, vector<32x128xf32>, vector<8x128xf32> -> vector<8x128xf32>
    %c0_54 = arith.constant 0 : index
    %c0_55 = arith.constant 0 : index
    %130 = vector.load %arg10[%c0_54, %c0_55] : memref<1x128xf32, #tpu.memory_space<vmem>>, vector<1x128xf32>
    %131 = vector.broadcast %130 : vector<1x128xf32> to vector<8x128xf32>
    %132 = arith.addf %129, %131 : vector<8x128xf32>
    %133 = arith.mulf %132, %132 : vector<8x128xf32>
    %134 = arith.mulf %132, %133 : vector<8x128xf32>
    %cst_56 = arith.constant 4.471500e-02 : f32
    %135 = vector.broadcast %cst_56 : f32 to vector<8x128xf32>
    %136 = arith.mulf %135, %134 : vector<8x128xf32>
    %137 = arith.addf %132, %136 : vector<8x128xf32>
    %cst_57 = arith.constant 0.797884583 : f32
    %138 = vector.broadcast %cst_57 : f32 to vector<8x128xf32>
    %139 = arith.mulf %138, %137 : vector<8x128xf32>
    %140 = math.tanh %139 : vector<8x128xf32>
    %cst_58 = arith.constant 1.000000e+00 : f32
    %141 = vector.broadcast %cst_58 : f32 to vector<8x128xf32>
    %142 = arith.addf %141, %140 : vector<8x128xf32>
    %cst_59 = arith.constant 5.000000e-01 : f32
    %143 = vector.broadcast %cst_59 : f32 to vector<8x128xf32>
    %144 = arith.mulf %143, %142 : vector<8x128xf32>
    %145 = arith.mulf %132, %144 : vector<8x128xf32>
    %c0_60 = arith.constant 0 : index
    %c0_61 = arith.constant 0 : index
    %146 = vector.load %arg11[%c0_60, %c0_61] : memref<128x32xf32, #tpu.memory_space<vmem>>, vector<128x32xf32>
    %cst_62 = arith.constant dense<0.000000e+00> : vector<8x32xf32>
    %147 = tpu.matmul %145, %146, %cst_62 {dimension_numbers = #tpu.dot_dimension_numbers<[1], [0], [0], [1], [0, 0, 1, 1], [], []>} : vector<8x128xf32>, vector<128x32xf32>, vector<8x32xf32> -> vector<8x32xf32>
    %148 = arith.addf %127, %147 : vector<8x32xf32>
    %c0_63 = arith.constant 0 : index
    %c0_64 = arith.constant 0 : index
    %149 = vector.load %arg12[%c0_63, %c0_64] : memref<1x32xf32, #tpu.memory_space<vmem>>, vector<1x32xf32>
    %150 = vector.broadcast %149 : vector<1x32xf32> to vector<8x32xf32>
    %151 = arith.addf %148, %150 : vector<8x32xf32>
    %c0_65 = arith.constant 0 : index
    %c0_66 = arith.constant 0 : index
    %152 = vector.load %arg13[%c0_65, %c0_66] : memref<1x32xf32, #tpu.memory_space<vmem>>, vector<1x32xf32>
    %c0_67 = arith.constant 0 : index
    %c0_68 = arith.constant 0 : index
    %153 = vector.load %arg14[%c0_67, %c0_68] : memref<1x32xf32, #tpu.memory_space<vmem>>, vector<1x32xf32>
    %cst_69 = arith.constant dense<0.000000e+00> : vector<8xf32>
    %154 = vector.multi_reduction <add>, %151, %cst_69 [1] : vector<8x32xf32> to vector<8xf32>
    %155 = vector.shape_cast %154 : vector<8xf32> to vector<8x1xf32>
    %cst_70 = arith.constant 3.200000e+01 : f32
    %156 = vector.broadcast %cst_70 : f32 to vector<8x1xf32>
    %157 = arith.divf %155, %156 : vector<8x1xf32>
    %158 = vector.broadcast %157 : vector<8x1xf32> to vector<8x32xf32>
    %159 = arith.subf %151, %158 : vector<8x32xf32>
    %160 = arith.mulf %159, %159 : vector<8x32xf32>
    %cst_71 = arith.constant dense<0.000000e+00> : vector<8xf32>
    %161 = vector.multi_reduction <add>, %160, %cst_71 [1] : vector<8x32xf32> to vector<8xf32>
    %162 = vector.shape_cast %161 : vector<8xf32> to vector<8x1xf32>
    %cst_72 = arith.constant 3.200000e+01 : f32
    %163 = vector.broadcast %cst_72 : f32 to vector<8x1xf32>
    %164 = arith.divf %162, %163 : vector<8x1xf32>
    %165 = vector.broadcast %157 : vector<8x1xf32> to vector<8x32xf32>
    %166 = arith.subf %151, %165 : vector<8x32xf32>
    %cst_73 = arith.constant 9.99999974E-6 : f32
    %167 = vector.broadcast %cst_73 : f32 to vector<8x1xf32>
    %168 = arith.addf %164, %167 : vector<8x1xf32>
    %169 = math.rsqrt %168 : vector<8x1xf32>
    %170 = vector.broadcast %169 : vector<8x1xf32> to vector<8x32xf32>
    %171 = arith.mulf %166, %170 : vector<8x32xf32>
    %172 = vector.broadcast %152 : vector<1x32xf32> to vector<8x32xf32>
    %173 = arith.mulf %171, %172 : vector<8x32xf32>
    %174 = vector.broadcast %153 : vector<1x32xf32> to vector<8x32xf32>
    %175 = arith.addf %173, %174 : vector<8x32xf32>
    %c0_74 = arith.constant 0 : index
    %c0_75 = arith.constant 0 : index
    %176 = vector.load %arg15[%c0_74, %c0_75] : memref<8x32xf32, #tpu.memory_space<vmem>>, vector<8x32xf32>
    tpu.vector_store %arg15[%c0_74, %c0_75], %175 {strides = array<i32>} : memref<8x32xf32, #tpu.memory_space<vmem>>, vector<8x32xf32>,
    return
  }
  func.func @transform_0(%arg0: i32) -> (i32, i32) {
    %c0_i32 = arith.constant 0 : i32
    %c0_i32_0 = arith.constant 0 : i32
    return %arg0, %c0_i32 : i32, i32
  }
  func.func @transform_1(%arg0: i32) -> (i32, i32, i32) {
    %c0_i32 = arith.constant 0 : i32
    %c0_i32_0 = arith.constant 0 : i32
    %c0_i32_1 = arith.constant 0 : i32
    return %arg0, %c0_i32, %c0_i32_0 : i32, i32, i32
  }
  func.func @transform_2(%arg0: i32) -> (i32, i32) {
    %c0_i32 = arith.constant 0 : i32
    %c0_i32_0 = arith.constant 0 : i32
    %c0_i32_1 = arith.constant 0 : i32
    return %c0_i32, %c0_i32_0 : i32, i32
  }
  func.func @transform_3(%arg0: i32) -> (i32, i32) {
    %c0_i32 = arith.constant 0 : i32
    %c0_i32_0 = arith.constant 0 : i32
    %c0_i32_1 = arith.constant 0 : i32
    return %c0_i32, %c0_i32_0 : i32, i32
  }
  func.func @transform_4(%arg0: i32) -> (i32, i32) {
    %c0_i32 = arith.constant 0 : i32
    %c0_i32_0 = arith.constant 0 : i32
    %c0_i32_1 = arith.constant 0 : i32
    return %c0_i32, %c0_i32_0 : i32, i32
  }
  func.func @transform_5(%arg0: i32) -> (i32, i32) {
    %c0_i32 = arith.constant 0 : i32
    %c0_i32_0 = arith.constant 0 : i32
    %c0_i32_1 = arith.constant 0 : i32
    return %c0_i32, %c0_i32_0 : i32, i32
  }
  func.func @transform_6(%arg0: i32) -> (i32, i32) {
    %c0_i32 = arith.constant 0 : i32
    %c0_i32_0 = arith.constant 0 : i32
    %c0_i32_1 = arith.constant 0 : i32
    return %c0_i32, %c0_i32_0 : i32, i32
  }
  func.func @transform_7(%arg0: i32) -> (i32, i32) {
    %c0_i32 = arith.constant 0 : i32
    %c0_i32_0 = arith.constant 0 : i32
    %c0_i32_1 = arith.constant 0 : i32
    return %c0_i32, %c0_i32_0 : i32, i32
  }
  func.func @transform_8(%arg0: i32) -> (i32, i32) {
    %c0_i32 = arith.constant 0 : i32
    %c0_i32_0 = arith.constant 0 : i32
    %c0_i32_1 = arith.constant 0 : i32
    return %c0_i32, %c0_i32_0 : i32, i32
  }
  func.func @transform_9(%arg0: i32) -> (i32, i32) {
    %c0_i32 = arith.constant 0 : i32
    %c0_i32_0 = arith.constant 0 : i32
    %c0_i32_1 = arith.constant 0 : i32
    return %c0_i32, %c0_i32_0 : i32, i32
  }
  func.func @transform_10(%arg0: i32) -> (i32, i32) {
    %c0_i32 = arith.constant 0 : i32
    %c0_i32_0 = arith.constant 0 : i32
    %c0_i32_1 = arith.constant 0 : i32
    return %c0_i32, %c0_i32_0 : i32, i32
  }
  func.func @transform_11(%arg0: i32) -> (i32, i32) {
    %c0_i32 = arith.constant 0 : i32
    %c0_i32_0 = arith.constant 0 : i32
    %c0_i32_1 = arith.constant 0 : i32
    return %c0_i32, %c0_i32_0 : i32, i32
  }
  func.func @transform_12(%arg0: i32) -> (i32, i32) {
    %c0_i32 = arith.constant 0 : i32
    %c0_i32_0 = arith.constant 0 : i32
    %c0_i32_1 = arith.constant 0 : i32
    return %c0_i32, %c0_i32_0 : i32, i32
  }
  func.func @transform_13(%arg0: i32) -> (i32, i32) {
    %c0_i32 = arith.constant 0 : i32
    %c0_i32_0 = arith.constant 0 : i32
    %c0_i32_1 = arith.constant 0 : i32
    return %c0_i32, %c0_i32_0 : i32, i32
  }
  func.func @transform_14(%arg0: i32) -> (i32, i32) {
    %c0_i32 = arith.constant 0 : i32
    %c0_i32_0 = arith.constant 0 : i32
    return %arg0, %c0_i32 : i32, i32
  }
}

</mosaic_0001>

<bundles_post_ra>
// kernel: decoder_forward.5
= control target key start
LH: loop header
LB: loop body
LE: loop exit
PB: predicated region body
PF: predicated region fallthrough
CT: control target
= control target key end

     0   :  { %10 = vsyncpa [#allocation4], 0  ;;  %s849_s0 = inlined_call_operand.vmem [shape: f32[16,32], index: 0, kind: input, shape index: {}]   ;;  %s850_s1 = inlined_call_operand.vmem [shape: f32[1,32], index: 1, kind: input, shape index: {}]   ;;  %s851_s2 = inlined_call_operand.vmem [shape: f32[1,32], index: 2, kind: input, shape index: {}]   ;;  %s852_s3 = inlined_call_operand.vmem [shape: f32[32,128], index: 3, kind: input, shape index: {}]   ;;  %s853_s4 = inlined_call_operand.vmem [shape: f32[1,128], index: 4, kind: input, shape index: {}]   ;;  %s854_s5 = inlined_call_operand.hbm [shape: f32[16,128], index: 5, kind: output, shape index: {}]  }
   0x1   :  { %12 = vsyncpa [#allocation4 + $0x1], 0  ;;  %s712_s18 = smov 0   ;;  %s714_s19 = smov 0  }
   0x2   :  { %s716_s20 = smov 0   ;;  %s718_s21 = smov 0  }
   0x3   :  { %s720_s22 = smov 0   ;;  %s722_s23 = smov 0  }
   0x4 LB: > { %s499_s24 = sadd.s32 4294967295, %s676_s23   ;;  %s500_s25 = sadd.s32 4294967294, %s676_s23   ;;  %s676_s23 = sphi %s722_s23, %s18_s23   ;;  %s672_s22 = sphi %s720_s22, %s861_s22   ;;  %s668_s21 = sphi %s718_s21, %s860_s21   ;;  %s664_s20 = sphi %s716_s20, %s859_s20   ;;  %s660_s19 = sphi %s714_s19, %s858_s19   ;;  %s656_s18 = sphi %s712_s18, %s857_s18  }
   0x5   : > { %s30_s26 = sadd.s32 1, %s672_s22  ;;  %s159_s27 = sadd.s32 1, %s664_s20 }
   0x6   : > { %p32_p0 = scmp.ge.s32.totalorder %s30_s26, 2  ;;  %p169_p1 = scmp.ne.s32.totalorder %s664_s20, %s660_s19 }
   0x7   : > { %p170_p2 = scmp.eq.s32.totalorder %s499_s24, 1  ;;  %p175_p3 = scmp.ne.s32.totalorder %s660_s19, %s656_s18 }
   0x8   : > { %s863_s26 = smov (%p32_p0, %s30_s26), 0  ;;  %p176_p5 = scmp.eq.s32.totalorder %s500_s25, 1 }
   0x9   : > { %p752_p4 = por %p170_p2, %p169_p1  ;;  %s154_s29 = ssub.s32 %s672_s22, %s863_s26 }
   0xa   : > { %p505_p6 = scmp.ge.s32.totalorder %s676_s23, 1  ;;  %p157_p7 = scmp.eq.s32.totalorder %s154_s29, 0 }
   0xb   : > { %p759_p8 = por %p176_p5, %p175_p3  ;;  %p220_p9 = scmp.lt.s32.totalorder %s676_s23, 3 }
   0xc   : > { %s765_s6 = scalar_select %p157_p7, %s664_s20, %s159_s27  }
   0xd   : > { %p221_p10 = pnand %p505_p6, %p220_p9 }
   0xe   : > { %p254_p11 = scmp.lt.s32.totalorder (!%p221_p10), %s668_s21, 1  ;;  %vm272_vm0 = vcmask (!%p221_p10), 261120   ;;  %v303_v7 = vld [vmem:[%s852_s3] sm:$0xff] (!%p221_p10)  ;;  %v304_v8 = vld [vmem:[%s852_s3 + $0x8] sm:$0xff] (!%p221_p10)  ;;  %v678_v10 = vmov (!%p221_p10), 0.0|0.0   ;;  %v305_v11 = vld [vmem:[%s852_s3 + $0x10] sm:$0xff] (!%p221_p10) }
   0xf   : > { %224 = sbr.rel (%p221_p10) target bundleno = 576 (0x240), region = 40  ;;  %v533_v9 = vpack.c.bf16 (!%p221_p10), %v304_v8, %v303_v7  ;;  %532 = vmatprep.subr.bf16.mxu0 (!%p221_p10), %v678_v10  ;;  %v306_v12 = vld [vmem:[%s852_s3 + $0x18] sm:$0xff] (!%p221_p10)  ;;  %vm679_vm1 = vmmov (!%p221_p10), 0   ;;  %v680_v14 = vmov (!%p221_p10), 0.0   ;;  %v508_v19 = vld [vmem:[%s850_s1] ss:$0 sm:$0xff] (!%p221_p10) }
  0x10   : > { %v536_v13 = vpack.c.bf16 (!%p221_p10), %v306_v12, %v305_v11  ;;  %529 = vmatprep.mubr.msk.f32.mxu0 (!%p221_p10), %vm679_vm1, %v680_v14  ;;  %v509_v21 = vld [vmem:[%s851_s2] ss:$0 sm:$0xff] (!%p221_p10)  ;;  %s251_s9 = sand.u32 (!%p221_p10), 1, %s660_s19   ;;  %s513_s13 = sshll.u32 (!%p221_p10), %s668_s21, 7 }
  0x11   : > { %534 = vmatpush3.bf16.msra.mxu0 (!%p221_p10), %v533_v9  ;;  %s506_s10 = sshll.u32 (!%p221_p10), %s251_s9, 3  ;;  %v510_v25 = vld [vmem:[%s853_s4] ss:$0 sm:$0xff] (!%p221_p10)  ;;  %s802_s24 = scalar_lea.hbm (!%p221_p10), %s854_s5, %s513_s13 }
  0x12   : > { %535 = vmatprep.subr.bf16.mxu0 (!%p221_p10), %v678_v10  ;;  %s253_s14 = scalar_lea.vmem (!%p221_p10), [#allocation3], %s506_s10  ;;  %s390_s25 = scalar_lea.sflag (!%p221_p10), [#allocation4], %s251_s9 }
  0x13   : > { %s404_s15 = sshll.u32 (!%p221_p10), %s253_s14, 4  ;;  %s804_s15 = int_to_ptr.vmem [resolvable:$true] %s404_s15 }
  0x14   : > { %s598_s27 = scalar_lea.vmem (!%p221_p10), %s804_s15, 128 }
  0x15   : > { %537 = vmatpush3.bf16.msra.mxu0 (!%p221_p10), %v536_v13  ;;  %p599_p12 = scmp.ne.s32.totalorder (!%p221_p10), %s804_s15, %s598_s27 }
  0x16   : > { %s255_s7 = scalar_select %p254_p11, %s668_s21, 1 }
  0x17   : > { %p600_p13 = pnand %p599_p12, %p752_p4  ;;  %s681_s21 = smov [#allocation3]  }
  0x18   : > { %s507_s8 = sshll.u32 %s255_s7, 3  ;;  %s602_s29 = sshll.u32 %s681_s21, 4  ;;  %s603_s29 = int_to_ptr.vmem [resolvable:$false] %s602_s29 }
  0x19   : > { %s257_s11 = scalar_lea.vmem %s849_s0, %s507_s8  ;;  %p601_p0 = pneg %p600_p13 }
  0x1a   : > { %v269_v0 = vld [vmem:[%s257_s11] sm:$0xff]  ;;  %s604_s7 = scalar_lea.vmem %s603_s29, 256  ;;  %p605_p1 = scmp.lt.s32.totalorder %s804_s15, %s603_s29 }
  0x1b   : > { %v273_v1 = vsel %vm272_vm0, %v269_v0, 0.0  ;;  %p606_p2 = scmp.lt.s32.totalorder %s604_s7, %s598_s27 }
  0x1c   : > { %274 = vadd.xlane.f32.xlu0 %v273_v1 }
  0x1d   : > { %p607_p3 = por %p606_p2, %p605_p1 }
  0x1f   : > { %p608_p5 = pnand %p607_p3, %p601_p0 }
  0xa9   : > { %v275_v2 = vpop.xlane.xlu0 %274 }
  0xaa   : > { %v277_v3 = vmul.f32 0.03125, %v275_v2 }
  0xac   : > { %v278_v4 = vsub.f32 %v269_v0, %v277_v3 }
  0xae   : > { %v279_v5 = vmul.f32 %v278_v4, %v278_v4 }
  0xb0   : > { %v280_v6 = vsel %vm272_vm0, %v279_v5, 0.0 }
  0xb1   : > { %281 = vadd.xlane.f32.xlu0 %v280_v6 }
 0x13e   : > { %v282_v15 = vpop.xlane.xlu0 %281 }
 0x13f   : > { %v283_v16 = vmul.f32 0.03125, %v282_v15 }
 0x141   : > { %v284_v17 = vadd.f32 1e-05, %v283_v16 }
 0x143   : > { %596 = vrsqrt.f32 %v284_v17 }
 0x14d   : > { %v597_v18 = vpop.eup %596 }
 0x14e   : > { %v286_v20 = vmul.f32 %v597_v18, %v278_v4 }
 0x150   : > { %v293_v22 = vmul.f32 %v508_v19, %v286_v20 }
 0x152   : > { %v300_v23 = vadd.f32 %v509_v21, %v293_v22 }
 0x154   : > { %301 = vst.msk [vmem:[#allocation2] sm:$0xff] %vm272_vm0, %v300_v23 }
 0x15b   : > { %v302_v24 = vld [vmem:[#allocation2] sm:$0xff] }
 0x15c   : > { %530 = vmatmul.mubr.msk.f32.vlgmr.msra.gmra.mrb[0].mxu0 %vm272_vm0, %v302_v24 }
 0x22f   : > { %v384_v26 = vpop.f32.mrb[0].mxu0 }
 0x230   : > { %v385_v27 = vadd.f32 %v510_v25, %v384_v26  ;;  %v531_v28 = vpop.f32.mrb[1].mxu0 }
 0x232   : > { %388 = vst [vmem:[%s253_s14] sm:$0xff] %v385_v27 }
 0x233   : > { %611 = shalt.err (!%p608_p5)
}
 0x234   : > { %s612_s8 = scalar_lea.hbm %s802_s24, 128  ;;  %s616_s11 = scalar_lea.hbm %s854_s5, 256 }
 0x235   : > { %p613_p6 = scmp.ne.s32.totalorder %s802_s24, %s612_s8  ;;  %p617_p10 = scmp.lt.u32.totalorder %s802_s24, %s854_s5 }
 0x236   : > { %p618_p11 = scmp.lt.u32.totalorder %s616_s11, %s612_s8  ;;  %p620_p13 = scmp.lt.u32.totalorder %s612_s8, %s802_s24 }
 0x237   : > { %p614_p7 = pnand %p613_p6, %p752_p4 }
 0x238   : > { %p619_p12 = por %p618_p11, %p617_p10 }
 0x239   : > { %p615_p9 = pneg %p614_p7 }
 0x23a   : > { %p621_p0 = por %p620_p13, %p619_p12 }
 0x23c   : > { %p622_p1 = pnand %p621_p0, %p615_p9 }
 0x23e   : > { %625 = shalt.err (!%p622_p1)
}
 0x23f   : > { %538 = dma.vmem_to_hbm [thread:$0]  (%p752_p4), %s804_s15, 128, %s802_s24, %s390_s25  }
 0x240 PF: > { %p544_p2 = scmp.ge.s32.totalorder %s676_s23, 2  ;;  %s416_s14 = sand.u32 1, %s656_s18  }
 0x241   : > { %s417_s16 = scalar_lea.sflag [#allocation4], %s416_s14 }
 0x242   : > { %p541_p3 = pnand %p544_p2, %p759_p8 }
 0x244   : > { %651 = dma.done.wait (!%p541_p3), %s417_s16, 128  }
 0x245   : > { %653 = vsyncadd (!%p541_p3), %s417_s16, 4294967168  ;;  %s18_s23 = sadd.s32 1, %s676_s23   ;;  %s857_s18 = smov %s660_s19 }
 0x246   : > { %p15_p5 = scmp.ge.s32.totalorder %s18_s23, 4   ;;  %s858_s19 = smov %s664_s20 }
 0x247   : > { %s859_s20 = smov %s765_s6  ;;  %s860_s21 = smov %s672_s22 }
 0x248   : > { %s861_s22 = smov %s863_s26  ;;  %17 = sbr.rel (!%p15_p5) target bundleno = 4 (0x4), region = 85 }
 0x24f   :  { %422 = vsyncpa [#allocation4], 1 }
 0x250   :  { %424 = vsyncpa [#allocation4 + $0x1], 1 }

// kernel: decoder_forward.3
= control target key start
LH: loop header
LB: loop body
LE: loop exit
PB: predicated region body
PF: predicated region fallthrough
CT: control target
= control target key end

     0   :  { %s2037_s29 = smov 0   ;;  %s2275_s0 = inlined_call_operand.vmem [shape: f32[16,32], index: 0, kind: input, shape index: {}]   ;;  %s2276_s1 = inlined_call_operand.vmem [shape: f32[2,1,8], index: 1, kind: input, shape index: {}]   ;;  %s2277_s2 = inlined_call_operand.vmem [shape: f32[32,96], index: 2, kind: input, shape index: {}]   ;;  %s2278_s3 = inlined_call_operand.vmem [shape: f32[1,96], index: 3, kind: input, shape index: {}]   ;;  %s2279_s4 = inlined_call_operand.vmem [shape: f32[32,32], index: 4, kind: input, shape index: {}]   ;;  %s2280_s5 = inlined_call_operand.vmem [shape: f32[1,32], index: 5, kind: input, shape index: {}]   ;;  %s2281_s6 = inlined_call_operand.vmem [shape: f32[1,32], index: 6, kind: input, shape index: {}]   ;;  %s2282_s7 = inlined_call_operand.vmem [shape: f32[1,32], index: 7, kind: input, shape index: {}]   ;;  %s2283_s8 = inlined_call_operand.vmem [shape: f32[32,128], index: 8, kind: input, shape index: {}]   ;;  %s2284_s9 = inlined_call_operand.vmem [shape: f32[1,128], index: 9, kind: input, shape index: {}]   ;;  %s2285_s10 = inlined_call_operand.vmem [shape: f32[128,32], index: 10, kind: input, shape index: {}]   ;;  %s2286_s11 = inlined_call_operand.vmem [shape: f32[1,32], index: 11, kind: input, shape index: {}]   ;;  %s2287_s12 = inlined_call_operand.vmem [shape: f32[1,32], index: 12, kind: input, shape index: {}]   ;;  %s2288_s13 = inlined_call_operand.vmem [shape: f32[1,32], index: 13, kind: input, shape index: {}]   ;;  %s2289_s14 = inlined_call_operand.vmem [shape: f32[16,32], index: 14, kind: output, shape index: {}]  }
   0x1 LB: > { %s1658_s30 = sadd.s32 4294967295, %s1942_s29   ;;  %p1662_p0 = scmp.ge.s32.totalorder %s1942_s29, 1  ;;  %s1942_s29 = sphi %s2037_s29, %s24_s29  }
   0x2   : > { %p419_p1 = scmp.lt.s32.totalorder %s1942_s29, 3 }
   0x4   : > { %p420_p2 = pnand %p1662_p0, %p419_p1 }
   0x5   : > { %v478_v0 = vld [vmem:[%s2277_s2] sm:$0xff] (!%p420_p2)  ;;  %v479_v1 = vld [vmem:[%s2277_s2 + $0x8] sm:$0xff] (!%p420_p2)  ;;  %v480_v2 = vld [vmem:[%s2277_s2 + $0x10] sm:$0xff] (!%p420_p2)  ;;  %v1944_v3 = vmov (!%p420_p2), 0.0|0.0   ;;  %vm1945_vm0 = vmmov (!%p420_p2), 0   ;;  %v1946_v6 = vmov (!%p420_p2), 0.0   ;;  %v564_v21 = vlaneseq (!%p420_p2) }
   0x6   : > { %423 = sbr.rel (%p420_p2) target bundleno = 2568 (0xa08), region = 76  ;;  %1846 = vmatprep.subr.bf16.mxu1 (!%p420_p2), %v1944_v3  ;;  %v1847_v4 = vpack.c.bf16 (!%p420_p2), %v479_v1, %v478_v0  ;;  %v481_v5 = vld [vmem:[%s2277_s2 + $0x18] sm:$0xff] (!%p420_p2)  ;;  %1746 = vmatprep.mubr.msk.f32.mxu1 (!%p420_p2), %vm1945_vm0, %v1946_v6  ;;  %p466_p3 = scmp.lt.s32.totalorder (!%p420_p2), %s1658_s30, 1  ;;  %vm489_vm1 = vcmask (!%p420_p2), 261120   ;;  %v1665_v9 = vld [vmem:[%s2278_s3] ss:$0 sm:$0xff] (!%p420_p2) }
   0x7   : > { %1759 = vmatprep.subr.mxu0 (!%p420_p2), %v1946_v6  ;;  %1761 = vmatprep.mubr.msk.f32.mxu0 (!%p420_p2), %vm1945_vm0, %v1946_v6  ;;  %v1850_v7 = vpack.c.bf16 (!%p420_p2), %v481_v5, %v480_v2  ;;  %s1947_s15 = smov (!%p420_p2), 96   ;;  %s1948_s16 = smov (!%p420_p2), 120   ;;  %vm581_vm2 = vcmask (!%p420_p2), 64512   ;;  %v565_v23 = vshrl.u32 (!%p420_p2), %v564_v21, 7  ;;  %v1954_v25 = vmov (!%p420_p2), 0   ;;  %v1266_v29 = vld [vmem:[%s2279_s4 + $0x18] sm:$0xff] (!%p420_p2) }
   0x8   : > { %1848 = vmatpush3.bf16.msra.mxu1 (!%p420_p2), %v1847_v4  ;;  %s1949_s17 = smov (!%p420_p2), 88   ;;  %s1950_s18 = smov (!%p420_p2), 80   ;;  %v567_v27 = vand.u32 (!%p420_p2), 127, %v564_v21  ;;  %vm916_vm7 = vcmask (!%p420_p2), 130112   ;;  %vm1088_vm8 = vcmask (!%p420_p2), 195712   ;;  %vm1260_vm9 = vcmask (!%p420_p2), 261312  }
   0x9   : > { %1849 = vmatprep.subr.bf16.mxu1 (!%p420_p2), %v1944_v3  ;;  %s1951_s19 = smov (!%p420_p2), 112   ;;  %s1952_s20 = smov (!%p420_p2), 72   ;;  %v574_v24 = vsub.s32 (!%p420_p2), 0, %v565_v23 }
   0xa   : > { %s1953_s21 = smov (!%p420_p2), 104   ;;  %vm568_vm4 = vcmp.le.s32.totalorder (!%p420_p2), %v567_v27, %v565_v23  ;;  %s1956_s27 = smov (!%p420_p2), 64  }
   0xb   : > { %s1957_s28 = smov (!%p420_p2), 48  }
   0xc   : > { %1851 = vmatpush3.bf16.msra.mxu1 (!%p420_p2), %v1850_v7 }
   0xd   : > { %s2293_s30 = smov (!%p466_p3, %s1658_s30), 1  ;;  %1749 = vmatprep.subr.mxu1 %v1946_v6 }
   0xe   : > { %s1663_s23 = sshll.u32 %s2293_s30, 3  ;;  %s472_s25 = scalar_lea.vmem %s2276_s1, %s2293_s30 }
   0xf   : > { %s469_s26 = scalar_lea.vmem %s2275_s0, %s1663_s23  ;;  %v569_v22 = vld [vmem:[%s472_s25] sm:$0x1] }
  0x10   : > { %v2072_v8 = vld [vmem:[%s469_s26] sm:$0xff]  ;;  %vm570_vm3 = vcmp.ne.f32.partialorder %v569_v22, 0.0  ;;  %s1955_s26 = smov 56  }
  0x11   : > { %1747 = vmatmul.mubr.msk.f32.vlgmr.msra.gmra.mrb[0].mxu1 %vm489_vm1, %v2072_v8  ;;  %v571_v26 = vsel %vm570_vm3, 1, %v1954_v25  ;;  %v1263_v25 = vld [vmem:[%s2279_s4] sm:$0xff] }
  0x12   : > { %1751 = vmatprep.mubr.msk.f32.mxu1 %vm1945_vm0, %v1946_v6  ;;  %v575_v28 = vrot.slane %v571_v26, %v574_v24  ;;  %v1264_v26 = vld [vmem:[%s2279_s4 + $0x8] sm:$0xff] }
  0x13   : > { %v1853_v27 = vpack.c.bf16 %v1264_v26, %v1263_v25  ;;  %v1683_v26 = vld [vmem:[%s2284_s9] ss:$0 sm:$0xff] }
  0x14   : > { %vm576_vm5 = vcmp.eq.s32.totalorder %v575_v28, 1  ;;  %v1265_v28 = vld [vmem:[%s2279_s4 + $0x10] sm:$0xff] }
  0x15   : > { %vm2113_vm6 = vmand %vm568_vm4, %vm576_vm5 }
  0xe4   : > { %v559_v10 = vpop.f32.mrb[0].mxu1 }
  0xe5   : > { %v2082_v11 = vadd.f32 %v1665_v9, %v559_v10  ;;  %v1748_v12 = vpop.f32.mrb[1].mxu1 }
  0xe7   : > { %579 = vrot.lane.b32.xlu0 %v2082_v11, %s1947_s15  ;;  %v563_v13 = vmul.f32 0.35355338, %v2082_v11  ;;  %s1958_s15 = smov 40  }
  0xe9   : > { %746 = vrot.lane.b32.xlu1 %v563_v13, %s1948_s16  ;;  %s1959_s16 = smov 8  }
  0xeb   : > { %748 = vrot.lane.b32.xlu0 %v2082_v11, %s1949_s17 }
  0xed   : > { %920 = vrot.lane.b32.xlu1 %v2082_v11, %s1950_s18  ;;  %s476_s18 = scalar_lea.vmem %s2289_s14, %s1663_s23 }
  0xef   : > { %918 = vrot.lane.b32.xlu0 %v563_v13, %s1951_s19 }
  0xf1   : > { %1092 = vrot.lane.b32.xlu1 %v2082_v11, %s1952_s20 }
  0xf3   : > { %1090 = vrot.lane.b32.xlu0 %v563_v13, %s1953_s21 }
 0x159   : > { %v580_v14 = vpop.permute.xlu0 %579 }
 0x15a   : > { %1750 = vmatpush3.xpose.msk.msra.mxu1 %vm581_vm2, %v580_v14 }
 0x15b   : > { %v747_v15 = vpop.permute.xlu1 %746  ;;  %1754 = vmatprep.subr.mxu1 %v1946_v6 }
 0x15d   : > { %v749_v16 = vpop.permute.xlu0 %748  ;;  %1752 = vmatmul.mubr.msk.f32.vlgmr.msra.gmra.mrb[2].mxu1 %vm581_vm2, %v563_v13 }
 0x15e   : > { %1760 = vmatpush3.xpose.msk.msra.mxu0 %vm581_vm2, %v749_v16  ;;  %1756 = vmatprep.mubr.msk.f32.mxu1 %vm1945_vm0, %v1946_v6 }
 0x15f   : > { %v921_v17 = vpop.permute.xlu1 %920  ;;  %1769 = vmatprep.subr.mxu0 %v1946_v6 }
 0x161   : > { %1762 = vmatmul.mubr.msk.f32.vlgmr.msra.gmra.mrb[0].mxu0 %vm581_vm2, %v747_v15  ;;  %v919_v18 = vpop.permute.xlu0 %918 }
 0x162   : > { %1770 = vmatpush3.xpose.msk.msra.mxu0 %vm581_vm2, %v921_v17  ;;  %1771 = vmatprep.mubr.msk.f32.mxu0 %vm1945_vm0, %v1946_v6 }
 0x163   : > { %1779 = vmatprep.subr.mxu0 %v1946_v6  ;;  %v1093_v19 = vpop.permute.xlu1 %1092 }
 0x165   : > { %1772 = vmatmul.mubr.msk.f32.vlgmr.msra.gmra.mrb[2].mxu0 %vm581_vm2, %v919_v18  ;;  %v1091_v20 = vpop.permute.xlu0 %1090 }
 0x166   : > { %1780 = vmatpush3.xpose.msk.msra.mxu0 %vm581_vm2, %v1093_v19  ;;  %1781 = vmatprep.mubr.msk.f32.mxu0 %vm1945_vm0, %v1946_v6 }
 0x167   : > { %1864 = vmatprep.subr.bf16.mxu0 %v1944_v3 }
 0x169   : > { %1782 = vmatmul.mubr.msk.f32.vlgmr.msra.gmra.mrb[4].mxu0 %vm581_vm2, %v1091_v20 }
 0x16a   : > { %1843 = vmatprep.mubr.msk.f32.mxu0 %vm1945_vm0, %v1946_v6 }
 0x230   : > { %v653_v30 = vpop.f32.mrb[2].mxu1 }
 0x231   : > { %v657_v31 = vsel %vm2113_vm6, %v653_v30, -1.7014117e+38  ;;  %v1753_v32 = vpop.f32.mrb[3].mxu1  ;;  %v1856_v30 = vpack.c.bf16 %v1266_v29, %v1265_v28 }
 0x232   : > { %v658_v33 = vsel %vm581_vm2, %v657_v31, -inf }
 0x233   : > { %659 = vmax.xlane.f32.xlu1 %v658_v33 }
 0x234   : > { %v820_v34 = vpop.f32.mrb[0].mxu0 }
 0x235   : > { %v824_v35 = vsel %vm2113_vm6, %v820_v34, -1.7014117e+38  ;;  %v1763_v36 = vpop.f32.mrb[1].mxu0 }
 0x236   : > { %v825_v37 = vsel %vm581_vm2, %v824_v35, -inf }
 0x237   : > { %826 = vmax.xlane.f32.xlu0 %v825_v37 }
 0x238   : > { %v992_v38 = vpop.f32.mrb[2].mxu0 }
 0x239   : > { %v996_v39 = vsel %vm2113_vm6, %v992_v38, -1.7014117e+38  ;;  %v1773_v40 = vpop.f32.mrb[3].mxu0 }
 0x23a   : > { %v997_v41 = vsel %vm581_vm2, %v996_v39, -inf }
 0x23b   : > { %998 = vmax.xlane.f32.xlu0 %v997_v41 }
 0x23c   : > { %v1164_v42 = vpop.f32.mrb[4].mxu0 }
 0x23d   : > { %v1168_v43 = vsel %vm2113_vm6, %v1164_v42, -1.7014117e+38  ;;  %v1783_v44 = vpop.f32.mrb[5].mxu0 }
 0x23e   : > { %v1169_v45 = vsel %vm581_vm2, %v1168_v43, -inf }
 0x23f   : > { %1170 = vmax.xlane.f32.xlu1 %v1169_v45 }
 0x250   : > { %836 = vrot.lane.b32.xlu1 %v2082_v11, %s1955_s26  ;;  %s1960_s26 = smov 16  }
 0x2c0   : > { %v660_v46 = vpop.xlane.xlu1 %659 }
 0x2c1   : > { %v661_v47 = vsub.f32 %v657_v31, %v660_v46 }
 0x2c3   : > { %v662_v48 = vmul.f32 1.442695, %v661_v47 }
 0x2c4   : > { %v827_v49 = vpop.xlane.xlu0 %826 }
 0x2c5   : > { %1914 = vpow2.f32 %v662_v48  ;;  %v828_v50 = vsub.f32 %v824_v35, %v827_v49 }
 0x2c7   : > { %v829_v51 = vmul.f32 1.442695, %v828_v50  ;;  %v1379_v50 = vld [vmem:[%s2283_s8 + $0x8] sm:$0xff] }
 0x2c8   : > { %v999_v61 = vpop.xlane.xlu0 %998 }
 0x2c9   : > { %1916 = vpow2.f32 %v829_v51  ;;  %v1000_v62 = vsub.f32 %v996_v39, %v999_v61  ;;  %v1679_v39 = vld [vmem:[%s2280_s5] ss:$0 sm:$0xff] }
 0x2ca   : > { %v1681_v61 = vld [vmem:[%s2281_s6] ss:$0 sm:$0xff] }
 0x2cb   : > { %v1001_v63 = vmul.f32 1.442695, %v1000_v62 }
 0x2cc   : > { %v1171_v52 = vpop.xlane.xlu1 %1170 }
 0x2cd   : > { %v1172_v53 = vsub.f32 %v1168_v43, %v1171_v52  ;;  %v1381_v52 = vld [vmem:[%s2283_s8 + $0x18] sm:$0xff] }
 0x2cf   : > { %v1915_v54 = vpop.eup %1914  ;;  %v1173_v55 = vmul.f32 1.442695, %v1172_v53 }
 0x2d0   : > { %v664_v56 = vsel %vm581_vm2, %v1915_v54, 0.0  ;;  %v837_v2 = vpop.permute.xlu1 %836 }
 0x2d1   : > { %1918 = vpow2.f32 %v1173_v55  ;;  %665 = vadd.xlane.f32.xlu0 %v664_v56  ;;  %v1472_v55 = vld [vmem:[%s2285_s10 + $0x8] sm:$0xff] }
 0x2d2   : > { %1920 = vpow2.f32 %v1001_v63  ;;  %v1682_v63 = vld [vmem:[%s2282_s7] ss:$0 sm:$0xff] }
 0x2d3   : > { %v1917_v57 = vpop.eup %1916 }
 0x2d4   : > { %v831_v58 = vsel %vm581_vm2, %v1917_v57, 0.0 }
 0x2d5   : > { %832 = vadd.xlane.f32.xlu1 %v831_v58 }
 0x2db   : > { %v1919_v59 = vpop.eup %1918 }
 0x2dc   : > { %v1175_v60 = vsel %vm581_vm2, %v1919_v59, 0.0  ;;  %v1921_v0 = vpop.eup %1920 }
 0x2dd   : > { %1176 = vadd.xlane.f32.xlu1 %v1175_v60  ;;  %v1003_v1 = vsel %vm581_vm2, %v1921_v0, 0.0 }
 0x2e7   : > { %669 = vrot.lane.b32.xlu0 %v2082_v11, %s1956_s27  ;;  %s1961_s27 = smov 24  }
 0x2ee   : > { %1008 = vrot.lane.b32.xlu1 %v2082_v11, %s1957_s28 }
 0x306   : > { %1004 = vadd.xlane.f32.xlu0 %v1003_v1 }
 0x31c   : > { %1180 = vrot.lane.b32.xlu0 %v2082_v11, %s1958_s15 }
 0x35e   : > { %v666_v4 = vpop.xlane.xlu0 %665 }
 0x35f   : > { %1922 = vrcp.f32 %v666_v4  ;;  %v1474_v4 = vld [vmem:[%s2285_s10 + $0x18] sm:$0xff] }
 0x362   : > { %v670_v5 = vpop.permute.xlu0 %669  ;;  %v833_v7 = vpop.xlane.xlu1 %832 }
 0x363   : > { %1924 = vrcp.f32 %v833_v7  ;;  %1755 = vmatpush3.msra.mxu1 %v670_v5  ;;  %v1475_v7 = vld [vmem:[%s2285_s10 + $0x20] sm:$0xff] }
 0x364   : > { %1764 = vmatprep.subr.mxu1 %v1946_v6 }
 0x369   : > { %v1923_v9 = vpop.eup %1922 }
 0x36a   : > { %v668_v10 = vmul.f32 %v1923_v9, %v1915_v54  ;;  %v1177_v12 = vpop.xlane.xlu1 %1176  ;;  %v1471_v54 = vld [vmem:[%s2285_s10] sm:$0xff]  ;;  %v1476_v9 = vld [vmem:[%s2285_s10 + $0x28] sm:$0xff] }
 0x36b   : > { %v1865_v56 = vpack.c.bf16 %v1472_v55, %v1471_v54 }
 0x36c   : > { %1757 = vmatmul.mubr.msk.f32.vlgmr.msra.gmra.mrb[4].mxu1 %vm581_vm2, %v668_v10  ;;  %v1871_v10 = vpack.c.bf16 %v1476_v9, %v1475_v7 }
 0x36d   : > { %v1925_v13 = vpop.eup %1924  ;;  %1765 = vmatpush3.msra.mxu1 %v837_v2  ;;  %1766 = vmatprep.mubr.msk.f32.mxu1 %vm1945_vm0, %v1946_v6  ;;  %v1473_v2 = vld [vmem:[%s2285_s10 + $0x10] sm:$0xff] }
 0x36e   : > { %v835_v11 = vmul.f32 %v1925_v13, %v1917_v57  ;;  %v1009_v14 = vpop.permute.xlu1 %1008  ;;  %1774 = vmatprep.subr.mxu1 %v1946_v6  ;;  %1866 = vmatpush3.bf16.msra.mxu0 %v1865_v56  ;;  %v1868_v5 = vpack.c.bf16 %v1474_v4, %v1473_v2  ;;  %v1478_v13 = vld [vmem:[%s2285_s10 + $0x38] sm:$0xff] }
 0x36f   : > { %1867 = vmatprep.subr.bf16.mxu0 %v1944_v3 }
 0x370   : > { %1767 = vmatmul.mubr.msk.f32.vlgmr.msra.gmra.mrb[6].mxu1 %vm581_vm2, %v835_v11 }
 0x371   : > { %1775 = vmatpush3.msra.mxu1 %v1009_v14  ;;  %1776 = vmatprep.mubr.msk.f32.mxu1 %vm1945_vm0, %v1946_v6  ;;  %v1479_v14 = vld [vmem:[%s2285_s10 + $0x40] sm:$0xff] }
 0x372   : > { %1784 = vmatprep.subr.mxu1 %v1946_v6  ;;  %1869 = vmatpush3.bf16.msra.mxu0 %v1868_v5 }
 0x373   : > { %1870 = vmatprep.subr.bf16.mxu0 %v1944_v3 }
 0x376   : > { %1872 = vmatpush3.bf16.msra.mxu0 %v1871_v10 }
 0x377   : > { %1873 = vmatprep.subr.bf16.mxu0 %v1944_v3 }
 0x393   : > { %v1005_v15 = vpop.xlane.xlu0 %1004 }
 0x394   : > { %1926 = vrcp.f32 %v1005_v15  ;;  %v1480_v15 = vld [vmem:[%s2285_s10 + $0x48] sm:$0xff] }
 0x395   : > { %1928 = vrcp.f32 %v1177_v12  ;;  %v1477_v12 = vld [vmem:[%s2285_s10 + $0x30] sm:$0xff] }
 0x396   : > { %v1874_v11 = vpack.c.bf16 %v1478_v13, %v1477_v12 }
 0x397   : > { %v1181_v19 = vpop.permute.xlu0 %1180 }
 0x398   : > { %1875 = vmatpush3.bf16.msra.mxu0 %v1874_v11 }
 0x399   : > { %1876 = vmatprep.subr.bf16.mxu0 %v1944_v3 }
 0x39e   : > { %v1927_v16 = vpop.eup %1926 }
 0x39f   : > { %v1007_v17 = vmul.f32 %v1927_v16, %v1921_v0  ;;  %v1929_v18 = vpop.eup %1928  ;;  %v1481_v16 = vld [vmem:[%s2285_s10 + $0x50] sm:$0xff] }
 0x3a0   : > { %v1179_v20 = vmul.f32 %v1929_v18, %v1919_v59  ;;  %v1482_v18 = vld [vmem:[%s2285_s10 + $0x58] sm:$0xff] }
 0x3a1   : > { %1777 = vmatmul.mubr.msk.f32.vlgmr.msra.gmra.mrb[8].mxu1 %vm581_vm2, %v1007_v17  ;;  %v1877_v17 = vpack.c.bf16 %v1480_v15, %v1479_v14 }
 0x3a2   : > { %1785 = vmatpush3.msra.mxu1 %v1181_v19  ;;  %1786 = vmatprep.mubr.msk.f32.mxu1 %vm1945_vm0, %v1946_v6  ;;  %v1880_v19 = vpack.c.bf16 %v1482_v18, %v1481_v16 }
 0x3a3   : > { %1852 = vmatprep.subr.bf16.mxu1 %v1944_v3  ;;  %1878 = vmatpush3.bf16.msra.mxu0 %v1877_v17 }
 0x3a4   : > { %1879 = vmatprep.subr.bf16.mxu0 %v1944_v3 }
 0x3a5   : > { %1787 = vmatmul.mubr.msk.f32.vlgmr.msra.gmra.mrb[10].mxu1 %vm581_vm2, %v1179_v20  ;;  %v1483_v20 = vld [vmem:[%s2285_s10 + $0x60] sm:$0xff] }
 0x3a6   : > { %1797 = vmatprep.mubr.msk.f32.mxu1 %vm1945_vm0, %v1946_v6  ;;  %1854 = vmatpush3.bf16.msra.mxu1 %v1853_v27 }
 0x3a7   : > { %1855 = vmatprep.subr.bf16.mxu1 %v1944_v3  ;;  %1881 = vmatpush3.bf16.msra.mxu0 %v1880_v19 }
 0x3a8   : > { %1882 = vmatprep.subr.bf16.mxu0 %v1944_v3 }
 0x3aa   : > { %1857 = vmatpush3.bf16.msra.mxu1 %v1856_v30 }
 0x3ab   : > { %1858 = vmatprep.subr.bf16.mxu1 %v1944_v3 }
 0x43f   : > { %v741_v21 = vpop.f32.mrb[4].mxu1 }
 0x440   : > { %745 = vst.msk [vmem:[#allocation2] sm:$0xff] %vm581_vm2, %v741_v21  ;;  %v1758_v22 = vpop.f32.mrb[5].mxu1  ;;  %v1484_v21 = vld [vmem:[%s2285_s10 + $0x68] sm:$0xff] }
 0x441   : > { %v1883_v22 = vpack.c.bf16 %v1484_v21, %v1483_v20 }
 0x443   : > { %v908_v23 = vpop.f32.mrb[6].mxu1  ;;  %1884 = vmatpush3.bf16.msra.mxu0 %v1883_v22 }
 0x444   : > { %913 = vrot.lane.b32.xlu1 %v908_v23, %s1959_s16  ;;  %v1768_v24 = vpop.f32.mrb[7].mxu1  ;;  %v1485_v23 = vld [vmem:[%s2285_s10 + $0x70] sm:$0xff]  ;;  %1885 = vmatprep.subr.bf16.mxu0 %v1944_v3 }
 0x445   : > { %v1486_v24 = vld [vmem:[%s2285_s10 + $0x78] sm:$0xff] }
 0x446   : > { %v1886_v25 = vpack.c.bf16 %v1486_v24, %v1485_v23 }
 0x448   : > { %1887 = vmatpush3.bf16.msra.mxu0 %v1886_v25 }
 0x474   : > { %v1080_v31 = vpop.f32.mrb[8].mxu1 }
 0x475   : > { %1085 = vrot.lane.b32.xlu0 %v1080_v31, %s1960_s26  ;;  %v1778_v32 = vpop.f32.mrb[9].mxu1 }
 0x478   : > { %v1252_v33 = vpop.f32.mrb[10].mxu1 }
 0x479   : > { %1257 = vrot.lane.b32.xlu1 %v1252_v33, %s1961_s27  ;;  %v1788_v34 = vpop.f32.mrb[11].mxu1 }
 0x4b6   : > { %v914_v35 = vpop.permute.xlu1 %913 }
 0x4b7   : > { %917 = vst.msk [vmem:[#allocation2] sm:$0xff] %vm916_vm7, %v914_v35 }
 0x4e7   : > { %v1086_v36 = vpop.permute.xlu0 %1085 }
 0x4e8   : > { %1089 = vst.msk [vmem:[#allocation2] sm:$0xff] %vm1088_vm8, %v1086_v36 }
 0x4eb   : > { %v1258_v37 = vpop.permute.xlu1 %1257 }
 0x4ec   : > { %1261 = vst.msk [vmem:[#allocation2] sm:$0xff] %vm1260_vm9, %v1258_v37 }
 0x4f3   : > { %v1262_v38 = vld [vmem:[#allocation2] sm:$0xff] }
 0x4f4   : > { %1798 = vmatmul.mubr.msk.f32.vlgmr.msra.gmra.mrb[12].mxu1 %vm489_vm1, %v1262_v38 }
 0x4f5   : > { %1808 = vmatprep.mubr.msk.f32.mxu1 %vm1945_vm0, %v1946_v6  ;;  %v1378_v6 = vld [vmem:[%s2283_s8] sm:$0xff] }
 0x4f6   : > { %v1859_v51 = vpack.c.bf16 %v1379_v50, %v1378_v6 }
 0x4f8   : > { %1860 = vmatpush3.bf16.msra.mxu1 %v1859_v51 }
 0x4f9   : > { %1861 = vmatprep.subr.bf16.mxu1 %v1944_v3 }
 0x5c7   : > { %v1343_v40 = vpop.f32.mrb[12].mxu1 }
 0x5c8   : > { %v1344_v41 = vadd.f32 %v1679_v39, %v1343_v40  ;;  %v1799_v42 = vpop.f32.mrb[13].mxu1  ;;  %v1685_v39 = vld [vmem:[%s2286_s11] ss:$0 sm:$0xff] }
 0x5ca   : > { %v1347_v43 = vadd.f32 %v1344_v41, %v2072_v8  ;;  %v1380_v8 = vld [vmem:[%s2283_s8 + $0x10] sm:$0xff] }
 0x5cb   : > { %v1862_v53 = vpack.c.bf16 %v1381_v52, %v1380_v8  ;;  %v1686_v8 = vld [vmem:[%s2287_s12] ss:$0 sm:$0xff] }
 0x5cc   : > { %v1350_v44 = vsel %vm489_vm1, %v1347_v43, 0.0 }
 0x5cd   : > { %1351 = vadd.xlane.f32.xlu0 %v1350_v44  ;;  %1863 = vmatpush3.bf16.msra.mxu1 %v1862_v53  ;;  %v1687_v53 = vld [vmem:[%s2288_s13] ss:$0 sm:$0xff] }
 0x65a   : > { %v1352_v45 = vpop.xlane.xlu0 %1351 }
 0x65b   : > { %v1354_v46 = vmul.f32 0.03125, %v1352_v45 }
 0x65d   : > { %v1355_v47 = vsub.f32 %v1347_v43, %v1354_v46 }
 0x65f   : > { %v1356_v48 = vmul.f32 %v1355_v47, %v1355_v47 }
 0x661   : > { %v1357_v49 = vsel %vm489_vm1, %v1356_v48, 0.0 }
 0x662   : > { %1358 = vadd.xlane.f32.xlu1 %v1357_v49 }
 0x6ef   : > { %v1359_v57 = vpop.xlane.xlu1 %1358 }
 0x6f0   : > { %v1360_v58 = vmul.f32 0.03125, %v1359_v57 }
 0x6f2   : > { %v1361_v59 = vadd.f32 1e-05, %v1360_v58 }
 0x6f4   : > { %1930 = vrsqrt.f32 %v1361_v59 }
 0x6fe   : > { %v1931_v60 = vpop.eup %1930 }
 0x6ff   : > { %v1363_v62 = vmul.f32 %v1931_v60, %v1355_v47 }
 0x701   : > { %v1370_v0 = vmul.f32 %v1681_v61, %v1363_v62 }
 0x703   : > { %v1377_v1 = vadd.f32 %v1682_v63, %v1370_v0 }
 0x705   : > { %1809 = vmatmul.mubr.msk.f32.vlgmr.msra.gmra.mrb[14].mxu1 %vm489_vm1, %v1377_v1 }
 0x7d8   : > { %v1458_v27 = vpop.f32.mrb[14].mxu1 }
 0x7d9   : > { %v1459_v28 = vadd.f32 %v1683_v26, %v1458_v27  ;;  %v1810_v29 = vpop.f32.mrb[15].mxu1 }
 0x7db   : > { %v1462_v30 = vmul.f32 %v1459_v28, %v1459_v28 }
 0x7dd   : > { %v1463_v31 = vmul.f32 %v1462_v30, %v1459_v28 }
 0x7df   : > { %v1464_v32 = vmul.f32 0.044715, %v1463_v31 }
 0x7e1   : > { %v1465_v33 = vadd.f32 %v1464_v32, %v1459_v28 }
 0x7e3   : > { %v1466_v34 = vmul.f32 0.7978846, %v1465_v33 }
 0x7e5   : > { %1932 = vtanh.f32 %v1466_v34 }
 0x7ef   : > { %v1933_v35 = vpop.eup %1932 }
 0x7f0   : > { %v1468_v36 = vadd.f32 1.0, %v1933_v35 }
 0x7f2   : > { %v1469_v37 = vmul.f32 0.5, %v1468_v36 }
 0x7f4   : > { %v1470_v38 = vmul.f32 %v1469_v37, %v1459_v28 }
 0x7f6   : > { %1844 = vmatmul.mubr.f32.vlgmr.msra.gmra.mrb[6].mxu0 %v1470_v38 }
 0x8c9   : > { %v1553_v3 = vpop.f32.mrb[6].mxu0 }
 0x8ca   : > { %v1557_v40 = vadd.f32 %v1553_v3, %v1377_v1  ;;  %v1845_v41 = vpop.f32.mrb[7].mxu0 }
 0x8cc   : > { %v1565_v42 = vadd.f32 %v1685_v39, %v1557_v40 }
 0x8ce   : > { %v1568_v43 = vsel %vm489_vm1, %v1565_v42, 0.0 }
 0x8cf   : > { %1569 = vadd.xlane.f32.xlu0 %v1568_v43 }
 0x95c   : > { %v1570_v44 = vpop.xlane.xlu0 %1569 }
 0x95d   : > { %v1571_v45 = vmul.f32 0.03125, %v1570_v44 }
 0x95f   : > { %v1572_v46 = vsub.f32 %v1565_v42, %v1571_v45 }
 0x961   : > { %v1573_v47 = vmul.f32 %v1572_v46, %v1572_v46 }
 0x963   : > { %v1574_v48 = vsel %vm489_vm1, %v1573_v47, 0.0 }
 0x964   : > { %1575 = vadd.xlane.f32.xlu0 %v1574_v48 }
 0x9f1   : > { %v1576_v49 = vpop.xlane.xlu0 %1575 }
 0x9f2   : > { %v1577_v6 = vmul.f32 0.03125, %v1576_v49 }
 0x9f4   : > { %v1578_v50 = vadd.f32 1e-05, %v1577_v6 }
 0x9f6   : > { %1934 = vrsqrt.f32 %v1578_v50 }
 0xa00   : > { %v1935_v51 = vpop.eup %1934 }
 0xa01   : > { %v1580_v52 = vmul.f32 %v1935_v51, %v1572_v46 }
 0xa03   : > { %v1587_v54 = vmul.f32 %v1686_v8, %v1580_v52 }
 0xa05   : > { %v1594_v55 = vadd.f32 %v1687_v53, %v1587_v54 }
 0xa07   : > { %1595 = vst.msk [vmem:[%s476_s18] sm:$0xff] %vm489_vm1, %v1594_v55 }
 0xa08 PF: > { %s24_s29 = sadd.s32 1, %s1942_s29  }
 0xa09   : > { %p21_p4 = scmp.ge.s32.totalorder %s24_s29, 4  }
 0xa0b   :  { %23 = sbr.rel (!%p21_p4) target bundleno = 1 (0x1), region = 109 }

</bundles_post_ra>
